<compile_context>
chip_gen: v7x
topology: tpu7x:2x2x1
jax: 0.10.0
libtpu: 0.0.40
codegen_flags: <defaults>
</compile_context>

<pallas_src>
import functools

import jax
import jax.numpy as jnp
from jax.experimental import pallas as pl
from jax.experimental.pallas import tpu as pltpu


def _round_up(n, m):
    return ((n + m - 1) // m) * m


def _lstm_kernel(x_ref, wx_ref, wh_ref, b_ref, wp_ref, bp_ref, p_ref,
                 *, T, Bp, Hp):
    # Hoisted, non-recurrent input projection for all timesteps in one MXU call:
    #   pre_x[t*Bp:(t+1)*Bp] = x_t @ [Wix|Wfx|Wox|Wgx]_pad + [bi|bf|bo|bg]_pad
    pre_x = (jnp.dot(x_ref[...], wx_ref[...],
                     preferred_element_type=jnp.float32)
             + b_ref[...])                                    # (T*Bp, 4*Hp)

    wh = wh_ref[...]                                          # (Hp, 4*Hp), resident
    h = jnp.zeros((Bp, Hp), jnp.float32)
    c = jnp.zeros((Bp, Hp), jnp.float32)

    # Fully unrolled recurrence (T is a small static int); only h @ Wh plus the
    # elementwise gate math is on the serial critical path.  All slices below
    # are at multiples of 128 lanes / 8 sublanes -> full-vreg views, no masked
    # relayouts or cross-lane movement.
    for t in range(T):
        pre = pre_x[t * Bp:(t + 1) * Bp, :] + jnp.dot(
            h, wh, preferred_element_type=jnp.float32)        # (Bp, 4*Hp)
        ifo = jax.nn.sigmoid(pre[:, :3 * Hp])                 # [i | f | o]
        g_t = jnp.tanh(pre[:, 3 * Hp:])
        i_t = ifo[:, :Hp]
        f_t = ifo[:, Hp:2 * Hp]
        o_t = ifo[:, 2 * Hp:]
        c = g_t * i_t + c * f_t
        h = jnp.tanh(c) * o_t

    # Final projection into a lane-dense (Bp, Cp) slab; caller slices to (B, C).
    p_ref[...] = (jnp.dot(h, wp_ref[...], preferred_element_type=jnp.float32)
                  + bp_ref[...]).astype(p_ref.dtype)


def prepare_params(params):
    """One-time weight fusion + lane padding (off the per-call hot path).

    Gate column order is [i | f | o | g]; each gate is padded to its own
    Hp=128-lane tile (padded columns/rows are zero), and the classifier is
    padded to a lane-dense Cp-wide slab.
    """
    D = params["Wix"].shape[0]
    H = params["Wih"].shape[0]
    C = params["Wph"].shape[1]
    Hp = _round_up(max(H, 128), 128)   # one (or more) full lane tiles per gate
    Cp = _round_up(C, 128)             # lane-dense output store (no masked vst)

    def pad_wx(w):   # (D, H) -> (D, Hp)
        return jnp.zeros((D, Hp), jnp.float32).at[:, :H].set(w)

    def pad_wh(w):   # (H, H) -> (Hp, Hp)
        return jnp.zeros((Hp, Hp), jnp.float32).at[:H, :H].set(w)

    def pad_b(b):    # (H,) -> (Hp,)
        return jnp.zeros((Hp,), jnp.float32).at[:H].set(b)

    wx = jnp.concatenate([pad_wx(params["Wix"]), pad_wx(params["Wfx"]),
                          pad_wx(params["Wox"]), pad_wx(params["Wgx"])],
                         axis=1)                               # (D, 4*Hp)
    wh = jnp.concatenate([pad_wh(params["Wih"]), pad_wh(params["Wfh"]),
                          pad_wh(params["Woh"]), pad_wh(params["Wgh"])],
                         axis=1)                               # (Hp, 4*Hp)
    b = jnp.concatenate([pad_b(params["bi"]), pad_b(params["bf"]),
                         pad_b(params["bo"]), pad_b(params["bg"])]
                        ).reshape(1, 4 * Hp)                   # (1, 4*Hp)
    wp = jnp.zeros((Hp, Cp), jnp.float32).at[:H, :C].set(params["Wph"])
    bp = jnp.zeros((1, Cp), jnp.float32).at[:, :C].set(params["bp"])

    return {"wx": wx, "wh": wh, "b": b, "wp": wp, "bp": bp}


def lstm_forward(x, prepped, num_classes):
    """x: [B, T, D] float32.  prepped: prepare_params(...) output.  -> [B, C]."""
    B, T, D = x.shape
    wx, wh, b, wp, bp = (prepped["wx"], prepped["wh"], prepped["b"],
                         prepped["wp"], prepped["bp"])
    Hp = wh.shape[0]
    Cp = wp.shape[1]
    Bp = _round_up(B, 8)      # pad batch to full sublanes

    # Per-call input prep only: time-major, batch-padded, flattened to
    # (T*Bp, D) so the whole input projection is one MXU call in the kernel.
    x_tbd = jnp.pad(jnp.transpose(x, (1, 0, 2)),
                    ((0, 0), (0, Bp - B), (0, 0)))             # (T, Bp, D)
    x2d = x_tbd.reshape(T * Bp, D).astype(jnp.float32)

    # VMEM-footprint guard for the single-block design (v7x: 32 MiB default
    # scoped / 64 MiB physical).  If this trips, chunk the time axis (grid over
    # T-chunks with h/c carried in scratch) instead of growing the block.
    vmem_bytes = 4 * (T * Bp * (D + 4 * Hp)        # x2d + pre_x
                      + D * 4 * Hp + Hp * 4 * Hp   # wx + wh
                      + 4 * Hp                     # bias
                      + Hp * Cp + Cp + Bp * Cp)    # wp + bp + output
    assert vmem_bytes < 16 * 1024 * 1024, (
        "single-block LSTM kernel footprint too large for VMEM; "
        "time-chunk the recurrence before scaling T/B/H this far")

    kernel = functools.partial(_lstm_kernel, T=T, Bp=Bp, Hp=Hp)

    p_full = pl.pallas_call(
        kernel,
        out_shape=jax.ShapeDtypeStruct((Bp, Cp), jnp.float32),
        in_specs=[pl.BlockSpec(memory_space=pltpu.MemorySpace.VMEM)
                  for _ in range(6)],
        out_specs=pl.BlockSpec(memory_space=pltpu.MemorySpace.VMEM),
    )(x2d, wx, wh, b, wp, bp)

    return p_full[:B, :num_classes]


def lstm_reference(x, params):
    """Pure-JAX reference matching the PyTorch forward exactly."""
    B, T, D = x.shape
    H = params["Wih"].shape[0]
    h = jnp.zeros((B, H), jnp.float32)
    c = jnp.zeros((B, H), jnp.float32)
    for t in range(T):
        x_t = x[:, t]
        i_t = jax.nn.sigmoid(x_t @ params["Wix"] + h @ params["Wih"] + params["bi"])
        f_t = jax.nn.sigmoid(x_t @ params["Wfx"] + h @ params["Wfh"] + params["bf"])
        g_t = jnp.tanh(x_t @ params["Wgx"] + h @ params["Wgh"] + params["bg"])
        o_t = jax.nn.sigmoid(x_t @ params["Wox"] + h @ params["Woh"] + params["bo"])
        c = g_t * i_t + c * f_t
        h = jnp.tanh(c) * o_t
    return h @ params["Wph"] + params["bp"]


def init_params(key, input_dim, num_hidden, num_classes, sigma=1.0):
    keys = jax.random.split(key, 9)
    return {
        "Wgx": sigma * jax.random.normal(keys[0], (input_dim, num_hidden), jnp.float32),
        "Wgh": sigma * jax.random.normal(keys[1], (num_hidden, num_hidden), jnp.float32),
        "bg":  jnp.zeros((num_hidden,), jnp.float32),
        "Wix": sigma * jax.random.normal(keys[2], (input_dim, num_hidden), jnp.float32),
        "Wih": sigma * jax.random.normal(keys[3], (num_hidden, num_hidden), jnp.float32),
        "bi":  jnp.zeros((num_hidden,), jnp.float32),
        "Wfx": sigma * jax.random.normal(keys[4], (input_dim, num_hidden), jnp.float32),
        "Wfh": sigma * jax.random.normal(keys[5], (num_hidden, num_hidden), jnp.float32),
        "bf":  jnp.zeros((num_hidden,), jnp.float32),
        "Wox": sigma * jax.random.normal(keys[6], (input_dim, num_hidden), jnp.float32),
        "Woh": sigma * jax.random.normal(keys[7], (num_hidden, num_hidden), jnp.float32),
        "bo":  jnp.zeros((num_hidden,), jnp.float32),
        "Wph": sigma * jax.random.normal(keys[8], (num_hidden, num_classes), jnp.float32),
        "bp":  jnp.zeros((num_classes,), jnp.float32),
    }


if __name__ == "__main__":
    seq_length = 8
    input_dim = 4
    num_hidden = 32
    num_classes = 10
    batch_size = 2

    key = jax.random.PRNGKey(0)
    k_x, k_p = jax.random.split(key)
    x = jax.random.normal(k_x, (batch_size, seq_length, input_dim), jnp.float32)
    params = init_params(k_p, input_dim, num_hidden, num_classes)

    # One-time weight fusion / padding, then the per-call forward.
    prepped = prepare_params(params)
    prepped = jax.tree_util.tree_map(jax.block_until_ready, prepped)

    p_out = lstm_forward(x, prepped, num_classes)
    p_out = jax.block_until_ready(p_out)

    p_ref = lstm_reference(x, params)
    assert p_out.shape == (batch_size, num_classes)
    assert jnp.allclose(p_out, p_ref, atol=1e-4, rtol=1e-4), "mismatch vs reference"

    print("KERNEL_OK")
</pallas_src>

<mosaic_0001>
module attributes {stable_mosaic.version = 11 : i64} {
  func.func @_lstm_kernel(%arg0: memref<64x4xf32, #tpu.memory_space<vmem>>, %arg1: memref<4x512xf32, #tpu.memory_space<vmem>>, %arg2: memref<128x512xf32, #tpu.memory_space<vmem>>, %arg3: memref<1x512xf32, #tpu.memory_space<vmem>>, %arg4: memref<128x128xf32, #tpu.memory_space<vmem>>, %arg5: memref<1x128xf32, #tpu.memory_space<vmem>>, %arg6: memref<8x128xf32, #tpu.memory_space<vmem>>) attributes {dimension_semantics = [], scalar_prefetch = 0 : i64, scratch_operands = 0 : i64, tpu.core_type = #tpu.core_type<tc>} {
    %c0 = arith.constant 0 : index
    %c0_0 = arith.constant 0 : index
    %0 = vector.load %arg0[%c0, %c0_0] : memref<64x4xf32, #tpu.memory_space<vmem>>, vector<64x4xf32>
    %c0_1 = arith.constant 0 : index
    %c0_2 = arith.constant 0 : index
    %1 = vector.load %arg1[%c0_1, %c0_2] : memref<4x512xf32, #tpu.memory_space<vmem>>, vector<4x512xf32>
    %cst = arith.constant dense<0.000000e+00> : vector<64x512xf32>
    %2 = tpu.matmul %0, %1, %cst {dimension_numbers = #tpu.dot_dimension_numbers<[1], [0], [0], [1], [0, 0, 1, 1], [], []>} : vector<64x4xf32>, vector<4x512xf32>, vector<64x512xf32> -> vector<64x512xf32>
    %c0_3 = arith.constant 0 : index
    %c0_4 = arith.constant 0 : index
    %3 = vector.load %arg3[%c0_3, %c0_4] : memref<1x512xf32, #tpu.memory_space<vmem>>, vector<1x512xf32>
    %4 = vector.broadcast %3 : vector<1x512xf32> to vector<64x512xf32>
    %5 = arith.addf %2, %4 : vector<64x512xf32>
    %c0_5 = arith.constant 0 : index
    %c0_6 = arith.constant 0 : index
    %6 = vector.load %arg2[%c0_5, %c0_6] : memref<128x512xf32, #tpu.memory_space<vmem>>, vector<128x512xf32>
    %cst_7 = arith.constant 0.000000e+00 : f32
    %7 = vector.broadcast %cst_7 : f32 to vector<8x128xf32>
    %cst_8 = arith.constant 0.000000e+00 : f32
    %8 = vector.broadcast %cst_8 : f32 to vector<8x128xf32>
    %9 = vector.extract_strided_slice %5 {offsets = [0, 0], sizes = [8, 512], strides = [1, 1]} : vector<64x512xf32> to vector<8x512xf32>
    %cst_9 = arith.constant dense<0.000000e+00> : vector<8x512xf32>
    %10 = tpu.matmul %7, %6, %cst_9 {dimension_numbers = #tpu.dot_dimension_numbers<[1], [0], [0], [1], [0, 0, 1, 1], [], []>} : vector<8x128xf32>, vector<128x512xf32>, vector<8x512xf32> -> vector<8x512xf32>
    %11 = arith.addf %9, %10 : vector<8x512xf32>
    %12 = vector.extract_strided_slice %11 {offsets = [0, 0], sizes = [8, 384], strides = [1, 1]} : vector<8x512xf32> to vector<8x384xf32>
    %13 = arith.negf %12 : vector<8x384xf32>
    %14 = math.exp %13 : vector<8x384xf32>
    %cst_10 = arith.constant 1.000000e+00 : f32
    %15 = vector.broadcast %cst_10 : f32 to vector<8x384xf32>
    %16 = arith.addf %15, %14 : vector<8x384xf32>
    %17 = arith.divf %15, %16 : vector<8x384xf32>
    %18 = vector.extract_strided_slice %11 {offsets = [0, 384], sizes = [8, 128], strides = [1, 1]} : vector<8x512xf32> to vector<8x128xf32>
    %19 = math.tanh %18 : vector<8x128xf32>
    %20 = vector.extract_strided_slice %17 {offsets = [0, 0], sizes = [8, 128], strides = [1, 1]} : vector<8x384xf32> to vector<8x128xf32>
    %21 = vector.extract_strided_slice %17 {offsets = [0, 128], sizes = [8, 128], strides = [1, 1]} : vector<8x384xf32> to vector<8x128xf32>
    %22 = vector.extract_strided_slice %17 {offsets = [0, 256], sizes = [8, 128], strides = [1, 1]} : vector<8x384xf32> to vector<8x128xf32>
    %23 = arith.mulf %19, %20 : vector<8x128xf32>
    %24 = arith.mulf %8, %21 : vector<8x128xf32>
    %25 = arith.addf %23, %24 : vector<8x128xf32>
    %26 = math.tanh %25 : vector<8x128xf32>
    %27 = arith.mulf %26, %22 : vector<8x128xf32>
    %28 = vector.extract_strided_slice %5 {offsets = [8, 0], sizes = [8, 512], strides = [1, 1]} : vector<64x512xf32> to vector<8x512xf32>
    %cst_11 = arith.constant dense<0.000000e+00> : vector<8x512xf32>
    %29 = tpu.matmul %27, %6, %cst_11 {dimension_numbers = #tpu.dot_dimension_numbers<[1], [0], [0], [1], [0, 0, 1, 1], [], []>} : vector<8x128xf32>, vector<128x512xf32>, vector<8x512xf32> -> vector<8x512xf32>
    %30 = arith.addf %28, %29 : vector<8x512xf32>
    %31 = vector.extract_strided_slice %30 {offsets = [0, 0], sizes = [8, 384], strides = [1, 1]} : vector<8x512xf32> to vector<8x384xf32>
    %32 = arith.negf %31 : vector<8x384xf32>
    %33 = math.exp %32 : vector<8x384xf32>
    %cst_12 = arith.constant 1.000000e+00 : f32
    %34 = vector.broadcast %cst_12 : f32 to vector<8x384xf32>
    %35 = arith.addf %34, %33 : vector<8x384xf32>
    %36 = arith.divf %34, %35 : vector<8x384xf32>
    %37 = vector.extract_strided_slice %30 {offsets = [0, 384], sizes = [8, 128], strides = [1, 1]} : vector<8x512xf32> to vector<8x128xf32>
    %38 = math.tanh %37 : vector<8x128xf32>
    %39 = vector.extract_strided_slice %36 {offsets = [0, 0], sizes = [8, 128], strides = [1, 1]} : vector<8x384xf32> to vector<8x128xf32>
    %40 = vector.extract_strided_slice %36 {offsets = [0, 128], sizes = [8, 128], strides = [1, 1]} : vector<8x384xf32> to vector<8x128xf32>
    %41 = vector.extract_strided_slice %36 {offsets = [0, 256], sizes = [8, 128], strides = [1, 1]} : vector<8x384xf32> to vector<8x128xf32>
    %42 = arith.mulf %38, %39 : vector<8x128xf32>
    %43 = arith.mulf %25, %40 : vector<8x128xf32>
    %44 = arith.addf %42, %43 : vector<8x128xf32>
    %45 = math.tanh %44 : vector<8x128xf32>
    %46 = arith.mulf %45, %41 : vector<8x128xf32>
    %47 = vector.extract_strided_slice %5 {offsets = [16, 0], sizes = [8, 512], strides = [1, 1]} : vector<64x512xf32> to vector<8x512xf32>
    %cst_13 = arith.constant dense<0.000000e+00> : vector<8x512xf32>
    %48 = tpu.matmul %46, %6, %cst_13 {dimension_numbers = #tpu.dot_dimension_numbers<[1], [0], [0], [1], [0, 0, 1, 1], [], []>} : vector<8x128xf32>, vector<128x512xf32>, vector<8x512xf32> -> vector<8x512xf32>
    %49 = arith.addf %47, %48 : vector<8x512xf32>
    %50 = vector.extract_strided_slice %49 {offsets = [0, 0], sizes = [8, 384], strides = [1, 1]} : vector<8x512xf32> to vector<8x384xf32>
    %51 = arith.negf %50 : vector<8x384xf32>
    %52 = math.exp %51 : vector<8x384xf32>
    %cst_14 = arith.constant 1.000000e+00 : f32
    %53 = vector.broadcast %cst_14 : f32 to vector<8x384xf32>
    %54 = arith.addf %53, %52 : vector<8x384xf32>
    %55 = arith.divf %53, %54 : vector<8x384xf32>
    %56 = vector.extract_strided_slice %49 {offsets = [0, 384], sizes = [8, 128], strides = [1, 1]} : vector<8x512xf32> to vector<8x128xf32>
    %57 = math.tanh %56 : vector<8x128xf32>
    %58 = vector.extract_strided_slice %55 {offsets = [0, 0], sizes = [8, 128], strides = [1, 1]} : vector<8x384xf32> to vector<8x128xf32>
    %59 = vector.extract_strided_slice %55 {offsets = [0, 128], sizes = [8, 128], strides = [1, 1]} : vector<8x384xf32> to vector<8x128xf32>
    %60 = vector.extract_strided_slice %55 {offsets = [0, 256], sizes = [8, 128], strides = [1, 1]} : vector<8x384xf32> to vector<8x128xf32>
    %61 = arith.mulf %57, %58 : vector<8x128xf32>
    %62 = arith.mulf %44, %59 : vector<8x128xf32>
    %63 = arith.addf %61, %62 : vector<8x128xf32>
    %64 = math.tanh %63 : vector<8x128xf32>
    %65 = arith.mulf %64, %60 : vector<8x128xf32>
    %66 = vector.extract_strided_slice %5 {offsets = [24, 0], sizes = [8, 512], strides = [1, 1]} : vector<64x512xf32> to vector<8x512xf32>
    %cst_15 = arith.constant dense<0.000000e+00> : vector<8x512xf32>
    %67 = tpu.matmul %65, %6, %cst_15 {dimension_numbers = #tpu.dot_dimension_numbers<[1], [0], [0], [1], [0, 0, 1, 1], [], []>} : vector<8x128xf32>, vector<128x512xf32>, vector<8x512xf32> -> vector<8x512xf32>
    %68 = arith.addf %66, %67 : vector<8x512xf32>
    %69 = vector.extract_strided_slice %68 {offsets = [0, 0], sizes = [8, 384], strides = [1, 1]} : vector<8x512xf32> to vector<8x384xf32>
    %70 = arith.negf %69 : vector<8x384xf32>
    %71 = math.exp %70 : vector<8x384xf32>
    %cst_16 = arith.constant 1.000000e+00 : f32
    %72 = vector.broadcast %cst_16 : f32 to vector<8x384xf32>
    %73 = arith.addf %72, %71 : vector<8x384xf32>
    %74 = arith.divf %72, %73 : vector<8x384xf32>
    %75 = vector.extract_strided_slice %68 {offsets = [0, 384], sizes = [8, 128], strides = [1, 1]} : vector<8x512xf32> to vector<8x128xf32>
    %76 = math.tanh %75 : vector<8x128xf32>
    %77 = vector.extract_strided_slice %74 {offsets = [0, 0], sizes = [8, 128], strides = [1, 1]} : vector<8x384xf32> to vector<8x128xf32>
    %78 = vector.extract_strided_slice %74 {offsets = [0, 128], sizes = [8, 128], strides = [1, 1]} : vector<8x384xf32> to vector<8x128xf32>
    %79 = vector.extract_strided_slice %74 {offsets = [0, 256], sizes = [8, 128], strides = [1, 1]} : vector<8x384xf32> to vector<8x128xf32>
    %80 = arith.mulf %76, %77 : vector<8x128xf32>
    %81 = arith.mulf %63, %78 : vector<8x128xf32>
    %82 = arith.addf %80, %81 : vector<8x128xf32>
    %83 = math.tanh %82 : vector<8x128xf32>
    %84 = arith.mulf %83, %79 : vector<8x128xf32>
    %85 = vector.extract_strided_slice %5 {offsets = [32, 0], sizes = [8, 512], strides = [1, 1]} : vector<64x512xf32> to vector<8x512xf32>
    %cst_17 = arith.constant dense<0.000000e+00> : vector<8x512xf32>
    %86 = tpu.matmul %84, %6, %cst_17 {dimension_numbers = #tpu.dot_dimension_numbers<[1], [0], [0], [1], [0, 0, 1, 1], [], []>} : vector<8x128xf32>, vector<128x512xf32>, vector<8x512xf32> -> vector<8x512xf32>
    %87 = arith.addf %85, %86 : vector<8x512xf32>
    %88 = vector.extract_strided_slice %87 {offsets = [0, 0], sizes = [8, 384], strides = [1, 1]} : vector<8x512xf32> to vector<8x384xf32>
    %89 = arith.negf %88 : vector<8x384xf32>
    %90 = math.exp %89 : vector<8x384xf32>
    %cst_18 = arith.constant 1.000000e+00 : f32
    %91 = vector.broadcast %cst_18 : f32 to vector<8x384xf32>
    %92 = arith.addf %91, %90 : vector<8x384xf32>
    %93 = arith.divf %91, %92 : vector<8x384xf32>
    %94 = vector.extract_strided_slice %87 {offsets = [0, 384], sizes = [8, 128], strides = [1, 1]} : vector<8x512xf32> to vector<8x128xf32>
    %95 = math.tanh %94 : vector<8x128xf32>
    %96 = vector.extract_strided_slice %93 {offsets = [0, 0], sizes = [8, 128], strides = [1, 1]} : vector<8x384xf32> to vector<8x128xf32>
    %97 = vector.extract_strided_slice %93 {offsets = [0, 128], sizes = [8, 128], strides = [1, 1]} : vector<8x384xf32> to vector<8x128xf32>
    %98 = vector.extract_strided_slice %93 {offsets = [0, 256], sizes = [8, 128], strides = [1, 1]} : vector<8x384xf32> to vector<8x128xf32>
    %99 = arith.mulf %95, %96 : vector<8x128xf32>
    %100 = arith.mulf %82, %97 : vector<8x128xf32>
    %101 = arith.addf %99, %100 : vector<8x128xf32>
    %102 = math.tanh %101 : vector<8x128xf32>
    %103 = arith.mulf %102, %98 : vector<8x128xf32>
    %104 = vector.extract_strided_slice %5 {offsets = [40, 0], sizes = [8, 512], strides = [1, 1]} : vector<64x512xf32> to vector<8x512xf32>
    %cst_19 = arith.constant dense<0.000000e+00> : vector<8x512xf32>
    %105 = tpu.matmul %103, %6, %cst_19 {dimension_numbers = #tpu.dot_dimension_numbers<[1], [0], [0], [1], [0, 0, 1, 1], [], []>} : vector<8x128xf32>, vector<128x512xf32>, vector<8x512xf32> -> vector<8x512xf32>
    %106 = arith.addf %104, %105 : vector<8x512xf32>
    %107 = vector.extract_strided_slice %106 {offsets = [0, 0], sizes = [8, 384], strides = [1, 1]} : vector<8x512xf32> to vector<8x384xf32>
    %108 = arith.negf %107 : vector<8x384xf32>
    %109 = math.exp %108 : vector<8x384xf32>
    %cst_20 = arith.constant 1.000000e+00 : f32
    %110 = vector.broadcast %cst_20 : f32 to vector<8x384xf32>
    %111 = arith.addf %110, %109 : vector<8x384xf32>
    %112 = arith.divf %110, %111 : vector<8x384xf32>
    %113 = vector.extract_strided_slice %106 {offsets = [0, 384], sizes = [8, 128], strides = [1, 1]} : vector<8x512xf32> to vector<8x128xf32>
    %114 = math.tanh %113 : vector<8x128xf32>
    %115 = vector.extract_strided_slice %112 {offsets = [0, 0], sizes = [8, 128], strides = [1, 1]} : vector<8x384xf32> to vector<8x128xf32>
    %116 = vector.extract_strided_slice %112 {offsets = [0, 128], sizes = [8, 128], strides = [1, 1]} : vector<8x384xf32> to vector<8x128xf32>
    %117 = vector.extract_strided_slice %112 {offsets = [0, 256], sizes = [8, 128], strides = [1, 1]} : vector<8x384xf32> to vector<8x128xf32>
    %118 = arith.mulf %114, %115 : vector<8x128xf32>
    %119 = arith.mulf %101, %116 : vector<8x128xf32>
    %120 = arith.addf %118, %119 : vector<8x128xf32>
    %121 = math.tanh %120 : vector<8x128xf32>
    %122 = arith.mulf %121, %117 : vector<8x128xf32>
    %123 = vector.extract_strided_slice %5 {offsets = [48, 0], sizes = [8, 512], strides = [1, 1]} : vector<64x512xf32> to vector<8x512xf32>
    %cst_21 = arith.constant dense<0.000000e+00> : vector<8x512xf32>
    %124 = tpu.matmul %122, %6, %cst_21 {dimension_numbers = #tpu.dot_dimension_numbers<[1], [0], [0], [1], [0, 0, 1, 1], [], []>} : vector<8x128xf32>, vector<128x512xf32>, vector<8x512xf32> -> vector<8x512xf32>
    %125 = arith.addf %123, %124 : vector<8x512xf32>
    %126 = vector.extract_strided_slice %125 {offsets = [0, 0], sizes = [8, 384], strides = [1, 1]} : vector<8x512xf32> to vector<8x384xf32>
    %127 = arith.negf %126 : vector<8x384xf32>
    %128 = math.exp %127 : vector<8x384xf32>
    %cst_22 = arith.constant 1.000000e+00 : f32
    %129 = vector.broadcast %cst_22 : f32 to vector<8x384xf32>
    %130 = arith.addf %129, %128 : vector<8x384xf32>
    %131 = arith.divf %129, %130 : vector<8x384xf32>
    %132 = vector.extract_strided_slice %125 {offsets = [0, 384], sizes = [8, 128], strides = [1, 1]} : vector<8x512xf32> to vector<8x128xf32>
    %133 = math.tanh %132 : vector<8x128xf32>
    %134 = vector.extract_strided_slice %131 {offsets = [0, 0], sizes = [8, 128], strides = [1, 1]} : vector<8x384xf32> to vector<8x128xf32>
    %135 = vector.extract_strided_slice %131 {offsets = [0, 128], sizes = [8, 128], strides = [1, 1]} : vector<8x384xf32> to vector<8x128xf32>
    %136 = vector.extract_strided_slice %131 {offsets = [0, 256], sizes = [8, 128], strides = [1, 1]} : vector<8x384xf32> to vector<8x128xf32>
    %137 = arith.mulf %133, %134 : vector<8x128xf32>
    %138 = arith.mulf %120, %135 : vector<8x128xf32>
    %139 = arith.addf %137, %138 : vector<8x128xf32>
    %140 = math.tanh %139 : vector<8x128xf32>
    %141 = arith.mulf %140, %136 : vector<8x128xf32>
    %142 = vector.extract_strided_slice %5 {offsets = [56, 0], sizes = [8, 512], strides = [1, 1]} : vector<64x512xf32> to vector<8x512xf32>
    %cst_23 = arith.constant dense<0.000000e+00> : vector<8x512xf32>
    %143 = tpu.matmul %141, %6, %cst_23 {dimension_numbers = #tpu.dot_dimension_numbers<[1], [0], [0], [1], [0, 0, 1, 1], [], []>} : vector<8x128xf32>, vector<128x512xf32>, vector<8x512xf32> -> vector<8x512xf32>
    %144 = arith.addf %142, %143 : vector<8x512xf32>
    %145 = vector.extract_strided_slice %144 {offsets = [0, 0], sizes = [8, 384], strides = [1, 1]} : vector<8x512xf32> to vector<8x384xf32>
    %146 = arith.negf %145 : vector<8x384xf32>
    %147 = math.exp %146 : vector<8x384xf32>
    %cst_24 = arith.constant 1.000000e+00 : f32
    %148 = vector.broadcast %cst_24 : f32 to vector<8x384xf32>
    %149 = arith.addf %148, %147 : vector<8x384xf32>
    %150 = arith.divf %148, %149 : vector<8x384xf32>
    %151 = vector.extract_strided_slice %144 {offsets = [0, 384], sizes = [8, 128], strides = [1, 1]} : vector<8x512xf32> to vector<8x128xf32>
    %152 = math.tanh %151 : vector<8x128xf32>
    %153 = vector.extract_strided_slice %150 {offsets = [0, 0], sizes = [8, 128], strides = [1, 1]} : vector<8x384xf32> to vector<8x128xf32>
    %154 = vector.extract_strided_slice %150 {offsets = [0, 128], sizes = [8, 128], strides = [1, 1]} : vector<8x384xf32> to vector<8x128xf32>
    %155 = vector.extract_strided_slice %150 {offsets = [0, 256], sizes = [8, 128], strides = [1, 1]} : vector<8x384xf32> to vector<8x128xf32>
    %156 = arith.mulf %152, %153 : vector<8x128xf32>
    %157 = arith.mulf %139, %154 : vector<8x128xf32>
    %158 = arith.addf %156, %157 : vector<8x128xf32>
    %159 = math.tanh %158 : vector<8x128xf32>
    %160 = arith.mulf %159, %155 : vector<8x128xf32>
    %c0_25 = arith.constant 0 : index
    %c0_26 = arith.constant 0 : index
    %161 = vector.load %arg4[%c0_25, %c0_26] : memref<128x128xf32, #tpu.memory_space<vmem>>, vector<128x128xf32>
    %cst_27 = arith.constant dense<0.000000e+00> : vector<8x128xf32>
    %162 = tpu.matmul %160, %161, %cst_27 {dimension_numbers = #tpu.dot_dimension_numbers<[1], [0], [0], [1], [0, 0, 1, 1], [], []>} : vector<8x128xf32>, vector<128x128xf32>, vector<8x128xf32> -> vector<8x128xf32>
    %c0_28 = arith.constant 0 : index
    %c0_29 = arith.constant 0 : index
    %163 = vector.load %arg5[%c0_28, %c0_29] : memref<1x128xf32, #tpu.memory_space<vmem>>, vector<1x128xf32>
    %164 = vector.broadcast %163 : vector<1x128xf32> to vector<8x128xf32>
    %165 = arith.addf %162, %164 : vector<8x128xf32>
    %c0_30 = arith.constant 0 : index
    %c0_31 = arith.constant 0 : index
    %166 = vector.load %arg6[%c0_30, %c0_31] : memref<8x128xf32, #tpu.memory_space<vmem>>, vector<8x128xf32>
    tpu.vector_store %arg6[%c0_30, %c0_31], %165 {strides = array<i32>} : memref<8x128xf32, #tpu.memory_space<vmem>>, vector<8x128xf32>,
    return
  }
}

</mosaic_0001>

<bundles_post_ra>
// kernel: tpu_custom_call.1
= control target key start
LH: loop header
LB: loop body
LE: loop exit
PB: predicated region body
PF: predicated region fallthrough
CT: control target
= control target key end

     0   :  { %11 = vsyncpa [#allocation3], 0  ;;  %s3351_s0 = inlined_call_operand.vmem [shape: f32[64,4], index: 0, kind: input, shape index: {}]   ;;  %s3352_s1 = inlined_call_operand.vmem [shape: f32[4,512], index: 1, kind: input, shape index: {}]   ;;  %s3353_s2 = inlined_call_operand.hbm [shape: f32[128,512], index: 2, kind: input, shape index: {}]   ;;  %s3354_s3 = inlined_call_operand.vmem [shape: f32[1,512], index: 3, kind: input, shape index: {}]   ;;  %s3355_s4 = inlined_call_operand.hbm [shape: f32[128,128], index: 4, kind: input, shape index: {}]   ;;  %s3356_s5 = inlined_call_operand.vmem [shape: f32[1,128], index: 5, kind: input, shape index: {}]   ;;  %s3357_s6 = inlined_call_operand.hbm [shape: f32[8,128], index: 6, kind: output, shape index: {}]  }
   0x1   :  { %12 = vsyncpa [#allocation6], 0 }
   0x2   :  { %13 = vsyncpa [#allocation4], 0  ;;  %s2791_s21 = smov [#allocation2]   ;;  %s2719_s25 = scalar_lea.hbm %s3353_s2, 8192 }
   0x3   :  { %s23_s22 = sshll.u32 %s2791_s21, 4  ;;  %p2720_p0 = scmp.ne.s32.totalorder %s3353_s2, %s2719_s25  ;;  %s24_s22 = int_to_ptr.vmem [resolvable:$true] %s23_s22 }
   0x4   :  { %p2723_p1 = scmp.lt.u32.totalorder %s2719_s25, %s3353_s2 }
   0x6   :  { %p2725_p2 = pnand %p2723_p1, %p2720_p0 }
   0x8   :  { %2728 = shalt.err (!%p2725_p2)
}
   0x9   :  { %s2729_s30 = scalar_lea.vmem %s24_s22, 8192  ;;  %p2734_p4 = scmp.lt.s32.totalorder %s24_s22, %s24_s22 }
   0xa   :  { %p2730_p3 = scmp.ne.s32.totalorder %s24_s22, %s2729_s30  ;;  %p2735_p5 = scmp.lt.s32.totalorder %s2729_s30, %s2729_s30 }
   0xc   :  { %p2736_p6 = por %p2735_p5, %p2734_p4 }
   0xe   :  { %p2737_p7 = pnand %p2736_p6, %p2730_p3 }
  0x10   :  { %2740 = shalt.err (!%p2737_p7)
}
  0x11   :  { %s2792_s7 = smov 512   ;;  %s2793_s8 = smov 32  }
  0x12   :  { %29 = dma.hbm_to_vmem [thread:$0]  %s3353_s2, 8192, %s24_s22, [#allocation3], %s2792_s7, %s2792_s7, %s2793_s8  }
  0x13   :  { %s2794_s11 = smov [#allocation5]   ;;  %s2741_s15 = scalar_lea.hbm %s3355_s4, 2048 }
  0x14   :  { %s37_s12 = sshll.u32 %s2794_s11, 4  ;;  %p2742_p8 = scmp.ne.s32.totalorder %s3355_s4, %s2741_s15  ;;  %s38_s12 = int_to_ptr.vmem [resolvable:$true] %s37_s12 }
  0x15   :  { %p2745_p9 = scmp.lt.u32.totalorder %s2741_s15, %s3355_s4 }
  0x17   :  { %p2747_p10 = pnand %p2745_p9, %p2742_p8 }
  0x19   :  { %2750 = shalt.err (!%p2747_p10)
}
  0x1a   :  { %s2751_s20 = scalar_lea.vmem %s38_s12, 2048  ;;  %p2756_p12 = scmp.lt.s32.totalorder %s38_s12, %s38_s12 }
  0x1b   :  { %p2752_p11 = scmp.ne.s32.totalorder %s38_s12, %s2751_s20  ;;  %p2757_p13 = scmp.lt.s32.totalorder %s2751_s20, %s2751_s20 }
  0x1d   :  { %p2758_p0 = por %p2757_p13, %p2756_p12 }
  0x1f   :  { %p2759_p1 = pnand %p2758_p0, %p2752_p11 }
  0x21   :  { %2762 = shalt.err (!%p2759_p1)
}
  0x22   :  { %s2795_s2 = smov 128   ;;  %s2796_s21 = smov 8  }
  0x23   :  { %43 = dma.hbm_to_vmem [thread:$0]  %s3355_s4, 2048, %s38_s12, [#allocation6], %s2795_s2, %s2795_s2, %s2796_s21  }
  0x24   :  { %2785 = dma.done.wait [#allocation3], 8192  }
  0x25   :  { %2786 = vsyncadd [#allocation3], 4294959104 }
  0x26   :  { %2787 = dma.done.wait [#allocation6], 2048  }
  0x27   :  { %2788 = vsyncadd [#allocation6], 4294965248  ;;  %v2797_v0 = vmov 0.0   ;;  %v60_v1 = vld [vmem:[%s3352_s1] sm:$0xff]  ;;  %vm113_vm0 = vcmask 1043456   ;;  %v61_v2 = vld [vmem:[%s3352_s1 + $0x8] sm:$0xff] }
  0x28   :  { %186 = vmatprep.mubr.f32.mxu0 %v2797_v0  ;;  %299 = vmatprep.mubr.f32.mxu1 %v2797_v0  ;;  %v52_v3 = vld [vmem:[%s3351_s0] sm:$0xff]  ;;  %v86_v4 = vcombine.high %v60_v1, %v60_v1  ;;  %v87_v5 = vcombine.high %v61_v2, %v61_v2  ;;  %v349_v6 = vld [vmem:[#allocation2 + $0x8] sm:$0xff]  ;;  %v351_v8 = vld [vmem:[#allocation2 + $0x18] sm:$0xff]  ;;  %vm88_vm1 = vcmask 31744   ;;  %vm2799_vm2 = vmmov 0   ;;  %s2800_s20 = smov [#allocation7]  }
  0x29   :  { %v353_v7 = vld [vmem:[#allocation2 + $0x28] sm:$0xff]  ;;  %v355_v10 = vld [vmem:[#allocation2 + $0x38] sm:$0xff]  ;;  %v348_v11 = vld [vmem:[#allocation2] sm:$0xff]  ;;  %s1872_s2 = sshll.u32 %s2800_s20, 4  ;;  %s1873_s2 = int_to_ptr.vmem [resolvable:$true] %s1872_s2 }
  0x2a   :  { %v2871_v9 = vpack.c.bf16 %v353_v7, %v349_v6  ;;  %v352_v12 = vld [vmem:[#allocation2 + $0x20] sm:$0xff]  ;;  %1882 = vmatprep.subr.msk.mxu0 %vm113_vm0, %v86_v4  ;;  %1892 = vmatprep.subr.msk.mxu1 %vm113_vm0, %v87_v5  ;;  %v2875_v13 = vpack.c.bf16 %v355_v10, %v351_v8  ;;  %v350_v15 = vld [vmem:[#allocation2 + $0x10] sm:$0xff]  ;;  %v357_v18 = vld [vmem:[#allocation2 + $0x48] sm:$0xff]  ;;  %s2763_s21 = scalar_lea.vmem %s1873_s2, 128  ;;  %p2768_p3 = scmp.lt.s32.totalorder %s1873_s2, %s1873_s2 }
  0x2b   :  { %v2877_v14 = vpack.c.bf16 %v352_v12, %v348_v11  ;;  %v354_v16 = vld [vmem:[#allocation2 + $0x30] sm:$0xff]  ;;  %1883 = vmatpush1.msk.msra.mxu0 %vm113_vm0, %v60_v1  ;;  %1893 = vmatpush1.msk.msra.mxu1 %vm113_vm0, %v61_v2  ;;  %v361_v19 = vld [vmem:[#allocation2 + $0x68] sm:$0xff]  ;;  %v359_v20 = vld [vmem:[#allocation2 + $0x58] sm:$0xff]  ;;  %p2764_p2 = scmp.ne.s32.totalorder %s1873_s2, %s2763_s21  ;;  %p2769_p4 = scmp.lt.s32.totalorder %s2763_s21, %s2763_s21 }
  0x2c   :  { %v2881_v17 = vpack.c.bf16 %v354_v16, %v350_v15  ;;  %1884 = vmatmul.mubr.msk.f32.vlgmr.msra.gmra.mrb[0].mxu0 %vm88_vm1, %v52_v3  ;;  %1894 = vmatmul.mubr.msk.f32.vlgmr.msra.gmra.mrb[0].mxu1 %vm88_vm1, %v52_v3  ;;  %v363_v21 = vld [vmem:[#allocation2 + $0x78] sm:$0xff]  ;;  %v356_v22 = vld [vmem:[#allocation2 + $0x40] sm:$0xff]  ;;  %v53_v24 = vld [vmem:[%s3351_s0 + $0x8] sm:$0xff]  ;;  %v2890_v25 = vpack.c.bf16 %v361_v19, %v357_v18 }
  0x2d   :  { %v360_v23 = vld [vmem:[#allocation2 + $0x60] sm:$0xff]  ;;  %1980 = vmatprep.subr.bf16.mxu0 %v2871_v9  ;;  %2012 = vmatprep.subr.bf16.mxu1 %v2875_v13  ;;  %v2892_v26 = vpack.c.bf16 %v363_v21, %v359_v20  ;;  %v358_v27 = vld [vmem:[#allocation2 + $0x50] sm:$0xff]  ;;  %v365_v31 = vld [vmem:[#allocation2 + $0x88] sm:$0xff]  ;;  %p2770_p5 = por %p2769_p4, %p2768_p3 }
  0x2e   :  { %v362_v28 = vld [vmem:[#allocation2 + $0x70] sm:$0xff]  ;;  %1982 = vmatpush1.bf16.msra.mxu0 %v2877_v14  ;;  %2014 = vmatpush1.bf16.msra.mxu1 %v2881_v17  ;;  %v2896_v29 = vpack.c.bf16 %v360_v23, %v356_v22  ;;  %v369_v32 = vld [vmem:[#allocation2 + $0xa8] sm:$0xff]  ;;  %v367_v33 = vld [vmem:[#allocation2 + $0x98] sm:$0xff] }
  0x2f   :  { %v2898_v30 = vpack.c.bf16 %v362_v28, %v358_v27  ;;  %192 = vmatprep.mubr.f32.mxu0 %v2797_v0  ;;  %305 = vmatprep.mubr.f32.mxu1 %v2797_v0  ;;  %v371_v34 = vld [vmem:[#allocation2 + $0xb8] sm:$0xff]  ;;  %v364_v35 = vld [vmem:[#allocation2 + $0x80] sm:$0xff]  ;;  %v366_v37 = vld [vmem:[#allocation2 + $0x90] sm:$0xff]  ;;  %v2909_v40 = vpack.c.bf16 %v369_v32, %v365_v31  ;;  %p2771_p6 = pnand %p2770_p5, %p2764_p2 }
  0x30   :  { %v368_v36 = vld [vmem:[#allocation2 + $0xa0] sm:$0xff]  ;;  %1885 = vmatmul.mubr.msk.f32.gmra.mrb[2].mxu0 %vm88_vm1, %v53_v24  ;;  %1895 = vmatmul.mubr.msk.f32.gmra.mrb[2].mxu1 %vm88_vm1, %v53_v24  ;;  %v370_v38 = vld [vmem:[#allocation2 + $0xb0] sm:$0xff]  ;;  %v2911_v41 = vpack.c.bf16 %v371_v34, %v367_v33  ;;  %v373_v42 = vld [vmem:[#allocation2 + $0xc8] sm:$0xff] }
  0x31   :  { %1984 = vmatprep.subr.bf16.mxu0 %v2890_v25  ;;  %2016 = vmatprep.subr.bf16.mxu1 %v2892_v26  ;;  %v54_v39 = vld [vmem:[%s3351_s0 + $0x10] sm:$0xff]  ;;  %v377_v43 = vld [vmem:[#allocation2 + $0xe8] sm:$0xff]  ;;  %v2915_v44 = vpack.c.bf16 %v368_v36, %v364_v35  ;;  %v2917_v45 = vpack.c.bf16 %v370_v38, %v366_v37  ;;  %v375_v46 = vld [vmem:[#allocation2 + $0xd8] sm:$0xff] }
  0x32   :  { %1986 = vmatpush1.bf16.msra.mxu0 %v2896_v29  ;;  %2018 = vmatpush1.bf16.msra.mxu1 %v2898_v30  ;;  %v379_v47 = vld [vmem:[#allocation2 + $0xf8] sm:$0xff]  ;;  %v372_v48 = vld [vmem:[#allocation2 + $0xc0] sm:$0xff]  ;;  %v374_v50 = vld [vmem:[#allocation2 + $0xd0] sm:$0xff]  ;;  %v2928_v53 = vpack.c.bf16 %v377_v43, %v373_v42 }
  0x33   :  { %198 = vmatprep.mubr.f32.mxu0 %v2797_v0  ;;  %311 = vmatprep.mubr.f32.mxu1 %v2797_v0  ;;  %v376_v49 = vld [vmem:[#allocation2 + $0xe0] sm:$0xff]  ;;  %v378_v51 = vld [vmem:[#allocation2 + $0xf0] sm:$0xff]  ;;  %v55_v52 = vld [vmem:[%s3351_s0 + $0x18] sm:$0xff]  ;;  %v2930_v54 = vpack.c.bf16 %v379_v47, %v375_v46 }
  0x34   :  { %1886 = vmatmul.mubr.msk.f32.gmra.mrb[4].mxu0 %vm88_vm1, %v54_v39  ;;  %1896 = vmatmul.mubr.msk.f32.gmra.mrb[4].mxu1 %vm88_vm1, %v54_v39  ;;  %v381_v55 = vld [vmem:[#allocation2 + $0x108] sm:$0xff]  ;;  %v2934_v57 = vpack.c.bf16 %v376_v49, %v372_v48  ;;  %v2936_v58 = vpack.c.bf16 %v378_v51, %v374_v50  ;;  %v383_v59 = vld [vmem:[#allocation2 + $0x118] sm:$0xff]  ;;  %v380_v61 = vld [vmem:[#allocation2 + $0x100] sm:$0xff] }
  0x35   :  { %1988 = vmatprep.subr.bf16.mxu0 %v2909_v40  ;;  %2020 = vmatprep.subr.bf16.mxu1 %v2911_v41  ;;  %v385_v56 = vld [vmem:[#allocation2 + $0x128] sm:$0xff]  ;;  %v387_v60 = vld [vmem:[#allocation2 + $0x138] sm:$0xff]  ;;  %v384_v62 = vld [vmem:[#allocation2 + $0x120] sm:$0xff] }
  0x36   :  { %1990 = vmatpush1.bf16.msra.mxu0 %v2915_v44  ;;  %2022 = vmatpush1.bf16.msra.mxu1 %v2917_v45  ;;  %v382_v63 = vld [vmem:[#allocation2 + $0x110] sm:$0xff]  ;;  %v56_v2 = vld [vmem:[%s3351_s0 + $0x20] sm:$0xff]  ;;  %v2947_v3 = vpack.c.bf16 %v385_v56, %v381_v55  ;;  %v2949_v4 = vpack.c.bf16 %v387_v60, %v383_v59  ;;  %v389_v5 = vld [vmem:[#allocation2 + $0x148] sm:$0xff]  ;;  %v2953_v7 = vpack.c.bf16 %v384_v62, %v380_v61  ;;  %v64_v62 = vlaneseq }
  0x37   :  { %204 = vmatprep.mubr.f32.mxu0 %v2797_v0  ;;  %317 = vmatprep.mubr.f32.mxu1 %v2797_v0  ;;  %v386_v1 = vld [vmem:[#allocation2 + $0x130] sm:$0xff]  ;;  %v393_v6 = vld [vmem:[#allocation2 + $0x168] sm:$0xff]  ;;  %v391_v10 = vld [vmem:[#allocation2 + $0x158] sm:$0xff] }
  0x38   :  { %1887 = vmatmul.mubr.msk.f32.gmra.mrb[6].mxu0 %vm88_vm1, %v55_v52  ;;  %1897 = vmatmul.mubr.msk.f32.gmra.mrb[6].mxu1 %vm88_vm1, %v55_v52  ;;  %v2955_v8 = vpack.c.bf16 %v386_v1, %v382_v63  ;;  %v395_v11 = vld [vmem:[#allocation2 + $0x178] sm:$0xff]  ;;  %v388_v12 = vld [vmem:[#allocation2 + $0x140] sm:$0xff]  ;;  %v390_v16 = vld [vmem:[#allocation2 + $0x150] sm:$0xff]  ;;  %v2966_v20 = vpack.c.bf16 %v393_v6, %v389_v5  ;;  %v65_v63 = vshrl.u32 %v64_v62, 7 }
  0x39   :  { %1992 = vmatprep.subr.bf16.mxu0 %v2928_v53  ;;  %2024 = vmatprep.subr.bf16.mxu1 %v2930_v54  ;;  %v392_v15 = vld [vmem:[#allocation2 + $0x160] sm:$0xff]  ;;  %v394_v18 = vld [vmem:[#allocation2 + $0x170] sm:$0xff]  ;;  %v57_v19 = vld [vmem:[%s3351_s0 + $0x28] sm:$0xff]  ;;  %v2968_v21 = vpack.c.bf16 %v395_v11, %v391_v10 }
  0x3a   :  { %1994 = vmatpush1.bf16.msra.mxu0 %v2934_v57  ;;  %2026 = vmatpush1.bf16.msra.mxu1 %v2936_v58  ;;  %v397_v22 = vld [vmem:[#allocation2 + $0x188] sm:$0xff]  ;;  %v2972_v24 = vpack.c.bf16 %v392_v15, %v388_v12  ;;  %v2974_v27 = vpack.c.bf16 %v394_v18, %v390_v16  ;;  %v399_v28 = vld [vmem:[#allocation2 + $0x198] sm:$0xff]  ;;  %v396_v32 = vld [vmem:[#allocation2 + $0x180] sm:$0xff]  ;;  %v66_v1 = vsub.s32 0, %v65_v63  ;;  %v70_v5 = vsub.s32 1, %v65_v63 }
  0x3b   :  { %210 = vmatprep.mubr.f32.mxu0 %v2797_v0  ;;  %323 = vmatprep.mubr.f32.mxu1 %v2797_v0  ;;  %v401_v23 = vld [vmem:[#allocation2 + $0x1a8] sm:$0xff]  ;;  %v403_v31 = vld [vmem:[#allocation2 + $0x1b8] sm:$0xff]  ;;  %v400_v33 = vld [vmem:[#allocation2 + $0x1a0] sm:$0xff]  ;;  %v74_v16 = vsub.s32 2, %v65_v63 }
  0x3c   :  { %1888 = vmatmul.mubr.msk.f32.gmra.mrb[8].mxu0 %vm88_vm1, %v56_v2  ;;  %1898 = vmatmul.mubr.msk.f32.gmra.mrb[8].mxu1 %vm88_vm1, %v56_v2  ;;  %v398_v34 = vld [vmem:[#allocation2 + $0x190] sm:$0xff]  ;;  %v2985_v37 = vpack.c.bf16 %v401_v23, %v397_v22  ;;  %v2987_v38 = vpack.c.bf16 %v403_v31, %v399_v28  ;;  %v405_v39 = vld [vmem:[#allocation2 + $0x1c8] sm:$0xff]  ;;  %v2991_v43 = vpack.c.bf16 %v400_v33, %v396_v32  ;;  %v407_v47 = vld [vmem:[#allocation2 + $0x1d8] sm:$0xff]  ;;  %v78_v31 = vsub.s32 3, %v65_v63 }
  0x3d   :  { %1996 = vmatprep.subr.bf16.mxu0 %v2947_v3  ;;  %2028 = vmatprep.subr.bf16.mxu1 %v2949_v4  ;;  %v402_v35 = vld [vmem:[#allocation2 + $0x1b0] sm:$0xff]  ;;  %v409_v42 = vld [vmem:[#allocation2 + $0x1e8] sm:$0xff]  ;;  %v411_v48 = vld [vmem:[#allocation2 + $0x1f8] sm:$0xff] }
  0x3e   :  { %1998 = vmatpush1.bf16.msra.mxu0 %v2953_v7  ;;  %2030 = vmatpush1.bf16.msra.mxu1 %v2955_v8  ;;  %v58_v36 = vld [vmem:[%s3351_s0 + $0x30] sm:$0xff]  ;;  %v2993_v46 = vpack.c.bf16 %v402_v35, %v398_v34  ;;  %v404_v49 = vld [vmem:[#allocation2 + $0x1c0] sm:$0xff]  ;;  %v59_v55 = vld [vmem:[%s3351_s0 + $0x38] sm:$0xff]  ;;  %v3004_v56 = vpack.c.bf16 %v409_v42, %v405_v39  ;;  %v3006_v59 = vpack.c.bf16 %v411_v48, %v407_v47 }
  0x3f   :  { %216 = vmatprep.mubr.f32.mxu0 %v2797_v0  ;;  %329 = vmatprep.mubr.f32.mxu1 %v2797_v0  ;;  %v408_v50 = vld [vmem:[#allocation2 + $0x1e0] sm:$0xff]  ;;  %v406_v51 = vld [vmem:[#allocation2 + $0x1d0] sm:$0xff] }
  0x40   :  { %1889 = vmatmul.mubr.msk.f32.gmra.mrb[10].mxu0 %vm88_vm1, %v57_v19  ;;  %1899 = vmatmul.mubr.msk.f32.gmra.mrb[10].mxu1 %vm88_vm1, %v57_v19  ;;  %v410_v52 = vld [vmem:[#allocation2 + $0x1f0] sm:$0xff]  ;;  %v3010_v60 = vpack.c.bf16 %v408_v50, %v404_v49  ;;  %v62_v2 = vld [vmem:[%s3354_s3] sm:$0xf] }
  0x41   :  { %2000 = vmatprep.subr.bf16.mxu0 %v2966_v20  ;;  %2032 = vmatprep.subr.bf16.mxu1 %v2968_v21  ;;  %v3012_v61 = vpack.c.bf16 %v410_v52, %v406_v51  ;;  %v3065_v6 = vrot.slane %v62_v2, %v66_v1  ;;  %v3067_v10 = vrot.slane %v62_v2, %v70_v5 }
  0x42   :  { %2002 = vmatpush1.bf16.msra.mxu0 %v2972_v24  ;;  %2034 = vmatpush1.bf16.msra.mxu1 %v2974_v27  ;;  %v3071_v32 = vrot.slane %v62_v2, %v74_v16  ;;  %v3073_v33 = vrot.slane %v62_v2, %v78_v31 }
  0x43   :  { %222 = vmatprep.mubr.f32.mxu0 %v2797_v0  ;;  %335 = vmatprep.mubr.f32.mxu1 %v2797_v0 }
  0x44   :  { %1890 = vmatmul.mubr.msk.f32.gmra.mrb[12].mxu0 %vm88_vm1, %v58_v36  ;;  %1900 = vmatmul.mubr.msk.f32.gmra.mrb[12].mxu1 %vm88_vm1, %v58_v36 }
  0x45   :  { %2004 = vmatprep.subr.bf16.mxu0 %v2985_v37  ;;  %2036 = vmatprep.subr.bf16.mxu1 %v2987_v38 }
  0x46   :  { %2006 = vmatpush1.bf16.msra.mxu0 %v2991_v43  ;;  %2038 = vmatpush1.bf16.msra.mxu1 %v2993_v46 }
  0x47   :  { %228 = vmatprep.mubr.f32.mxu0 %v2797_v0  ;;  %341 = vmatprep.mubr.f32.mxu1 %v2797_v0 }
  0x48   :  { %1891 = vmatmul.mubr.msk.f32.gmra.mrb[14].mxu0 %vm88_vm1, %v59_v55  ;;  %1901 = vmatmul.mubr.msk.f32.gmra.mrb[14].mxu1 %vm88_vm1, %v59_v55 }
  0x49   :  { %2008 = vmatprep.subr.bf16.mxu0 %v3004_v56  ;;  %2040 = vmatprep.subr.bf16.mxu1 %v3006_v59 }
  0x4a   :  { %2010 = vmatpush1.bf16.msra.mxu0 %v3010_v60  ;;  %2042 = vmatpush1.bf16.msra.mxu1 %v3012_v61 }
  0x4b   :  { %476 = vmatprep.mubr.f32.mxu0 %v2797_v0  ;;  %547 = vmatprep.mubr.f32.mxu1 %v2797_v0 }
  0x4c   :  { %2044 = vmatprep.subr.bf16.mxu0 %v2871_v9  ;;  %2076 = vmatprep.subr.bf16.mxu1 %v2875_v13 }
  0x4d   :  { %477 = vmatmul.mubr.f32.vlgmr.msra.gmra.mrb[0].mxu0 %v2797_v0  ;;  %548 = vmatmul.mubr.f32.vlgmr.msra.gmra.mrb[0].mxu1 %v2797_v0 }
  0x4e   :  { %2046 = vmatpush1.bf16.msra.mxu0 %v2877_v14  ;;  %2078 = vmatpush1.bf16.msra.mxu1 %v2881_v17 }
  0x4f   :  { %2048 = vmatprep.subr.bf16.mxu0 %v2890_v25  ;;  %2080 = vmatprep.subr.bf16.mxu1 %v2892_v26 }
  0x50   :  { %646 = vmatprep.mubr.f32.mxu0 %v2797_v0  ;;  %717 = vmatprep.mubr.f32.mxu1 %v2797_v0 }
  0x52   :  { %2050 = vmatpush1.bf16.msra.mxu0 %v2896_v29  ;;  %2082 = vmatpush1.bf16.msra.mxu1 %v2898_v30 }
  0x53   :  { %2052 = vmatprep.subr.bf16.mxu0 %v2909_v40  ;;  %2084 = vmatprep.subr.bf16.mxu1 %v2911_v41 }
  0x56   :  { %2054 = vmatpush1.bf16.msra.mxu0 %v2915_v44  ;;  %2086 = vmatpush1.bf16.msra.mxu1 %v2917_v45 }
  0x57   :  { %2056 = vmatprep.subr.bf16.mxu0 %v2928_v53  ;;  %2088 = vmatprep.subr.bf16.mxu1 %v2930_v54 }
  0x5a   :  { %2058 = vmatpush1.bf16.msra.mxu0 %v2934_v57  ;;  %2090 = vmatpush1.bf16.msra.mxu1 %v2936_v58 }
  0x5b   :  { %2060 = vmatprep.subr.bf16.mxu0 %v2947_v3  ;;  %2092 = vmatprep.subr.bf16.mxu1 %v2949_v4 }
  0x5e   :  { %2062 = vmatpush1.bf16.msra.mxu0 %v2953_v7  ;;  %2094 = vmatpush1.bf16.msra.mxu1 %v2955_v8 }
  0x5f   :  { %2064 = vmatprep.subr.bf16.mxu0 %v2966_v20  ;;  %2096 = vmatprep.subr.bf16.mxu1 %v2968_v21 }
  0x62   :  { %2066 = vmatpush1.bf16.msra.mxu0 %v2972_v24  ;;  %2098 = vmatpush1.bf16.msra.mxu1 %v2974_v27 }
  0x63   :  { %2068 = vmatprep.subr.bf16.mxu0 %v2985_v37  ;;  %2100 = vmatprep.subr.bf16.mxu1 %v2987_v38 }
  0x66   :  { %2070 = vmatpush1.bf16.msra.mxu0 %v2991_v43  ;;  %2102 = vmatpush1.bf16.msra.mxu1 %v2993_v46 }
  0x67   :  { %2072 = vmatprep.subr.bf16.mxu0 %v3004_v56  ;;  %2104 = vmatprep.subr.bf16.mxu1 %v3006_v59 }
  0x6a   :  { %2074 = vmatpush1.bf16.msra.mxu0 %v3010_v60  ;;  %2106 = vmatpush1.bf16.msra.mxu1 %v3012_v61 }
  0x6b   :  { %2108 = vmatprep.subr.bf16.mxu0 %v2871_v9  ;;  %2140 = vmatprep.subr.bf16.mxu1 %v2875_v13 }
 0x120   :  { %v478_v11 = vpop.f32.mrb[0].mxu0  ;;  %v549_v12 = vpop.f32.mrb[0].mxu1 }
 0x121   :  { %v2515_v15 = vadd.f32 %v478_v11, %v3065_v6  ;;  %v480_v18 = vpop.f32.mrb[1].mxu0  ;;  %v551_v19 = vpop.f32.mrb[1].mxu1  ;;  %v2531_v34 = vadd.f32 %v549_v12, %v3071_v32 }
 0x122   :  { %v2516_v22 = vadd.f32 %v480_v18, %v3067_v10  ;;  %v2532_v35 = vadd.f32 %v551_v19, %v3073_v33 }
 0x123   :  { %v1902_v23 = vmul.f32 -1.442695, %v2515_v15  ;;  %v1904_v36 = vmul.f32 -1.442695, %v2531_v34 }
 0x124   :  { %v1903_v28 = vmul.f32 -1.442695, %v2516_v22 }
 0x125   :  { %2591 = vpow2.f32 %v1902_v23 }
 0x126   :  { %2593 = vpow2.f32 %v1903_v28 }
 0x127   :  { %2595 = vtanh.f32 %v2532_v35 }
 0x128   :  { %2597 = vpow2.f32 %v1904_v36 }
 0x12f   :  { %v2592_v39 = vpop.eup %2591 }
 0x130   :  { %v567_v42 = vadd.f32 1.0, %v2592_v39  ;;  %v2594_v47 = vpop.eup %2593 }
 0x131   :  { %v568_v48 = vadd.f32 1.0, %v2594_v47  ;;  %v2596_v49 = vpop.eup %2595 }
 0x132   :  { %2599 = vrcp.f32 %v567_v42  ;;  %v2598_v50 = vpop.eup %2597 }
 0x133   :  { %2601 = vrcp.f32 %v568_v48  ;;  %v569_v62 = vadd.f32 1.0, %v2598_v50 }
 0x135   :  { %2603 = vrcp.f32 %v569_v62 }
 0x13c   :  { %v2600_v51 = vpop.eup %2599 }
 0x13d   :  { %v577_v52 = vmul.f32 %v2600_v51, %v2596_v49  ;;  %v2602_v55 = vpop.eup %2601 }
 0x13e   :  { %v578_v63 = vmul.f32 0.0, %v2602_v55 }
 0x13f   :  { %v2604_v2 = vpop.eup %2603 }
 0x140   :  { %v3077_v1 = vadd.f32 %v578_v63, %v577_v52 }
 0x142   :  { %2605 = vtanh.f32 %v3077_v1 }
 0x14c   :  { %v2606_v5 = vpop.eup %2605 }
 0x14d   :  { %v581_v11 = vmul.f32 %v2606_v5, %v2604_v2 }
 0x14f   :  { %647 = vmatmul.mubr.f32.vlgmr.msra.gmra.mrb[2].mxu0 %v581_v11  ;;  %718 = vmatmul.mubr.f32.vlgmr.msra.gmra.mrb[2].mxu1 %v581_v11 }
 0x150   :  { %2110 = vmatpush1.bf16.msra.mxu0 %v2877_v14  ;;  %2142 = vmatpush1.bf16.msra.mxu1 %v2881_v17 }
 0x151   :  { %2112 = vmatprep.subr.bf16.mxu0 %v2890_v25  ;;  %2144 = vmatprep.subr.bf16.mxu1 %v2892_v26 }
 0x152   :  { %816 = vmatprep.mubr.f32.mxu0 %v2797_v0  ;;  %887 = vmatprep.mubr.f32.mxu1 %v2797_v0 }
 0x154   :  { %2114 = vmatpush1.bf16.msra.mxu0 %v2896_v29  ;;  %2146 = vmatpush1.bf16.msra.mxu1 %v2898_v30 }
 0x155   :  { %2116 = vmatprep.subr.bf16.mxu0 %v2909_v40  ;;  %2148 = vmatprep.subr.bf16.mxu1 %v2911_v41 }
 0x158   :  { %2118 = vmatpush1.bf16.msra.mxu0 %v2915_v44  ;;  %2150 = vmatpush1.bf16.msra.mxu1 %v2917_v45 }
 0x159   :  { %2120 = vmatprep.subr.bf16.mxu0 %v2928_v53  ;;  %2152 = vmatprep.subr.bf16.mxu1 %v2930_v54 }
 0x15c   :  { %2122 = vmatpush1.bf16.msra.mxu0 %v2934_v57  ;;  %2154 = vmatpush1.bf16.msra.mxu1 %v2936_v58 }
 0x15d   :  { %2124 = vmatprep.subr.bf16.mxu0 %v2947_v3  ;;  %2156 = vmatprep.subr.bf16.mxu1 %v2949_v4 }
 0x160   :  { %2126 = vmatpush1.bf16.msra.mxu0 %v2953_v7  ;;  %2158 = vmatpush1.bf16.msra.mxu1 %v2955_v8 }
 0x161   :  { %2128 = vmatprep.subr.bf16.mxu0 %v2966_v20  ;;  %2160 = vmatprep.subr.bf16.mxu1 %v2968_v21 }
 0x164   :  { %2130 = vmatpush1.bf16.msra.mxu0 %v2972_v24  ;;  %2162 = vmatpush1.bf16.msra.mxu1 %v2974_v27 }
 0x165   :  { %2132 = vmatprep.subr.bf16.mxu0 %v2985_v37  ;;  %2164 = vmatprep.subr.bf16.mxu1 %v2987_v38 }
 0x168   :  { %2134 = vmatpush1.bf16.msra.mxu0 %v2991_v43  ;;  %2166 = vmatpush1.bf16.msra.mxu1 %v2993_v46 }
 0x169   :  { %2136 = vmatprep.subr.bf16.mxu0 %v3004_v56  ;;  %2168 = vmatprep.subr.bf16.mxu1 %v3006_v59 }
 0x16c   :  { %2138 = vmatpush1.bf16.msra.mxu0 %v3010_v60  ;;  %2170 = vmatpush1.bf16.msra.mxu1 %v3012_v61 }
 0x16d   :  { %2172 = vmatprep.subr.bf16.mxu0 %v2871_v9  ;;  %2204 = vmatprep.subr.bf16.mxu1 %v2875_v13 }
 0x222   :  { %v648_v12 = vpop.f32.mrb[2].mxu0  ;;  %v719_v15 = vpop.f32.mrb[2].mxu1 }
 0x223   :  { %v2517_v16 = vadd.f32 %v648_v12, %v3065_v6  ;;  %v650_v18 = vpop.f32.mrb[3].mxu0  ;;  %v721_v19 = vpop.f32.mrb[3].mxu1  ;;  %v2533_v31 = vadd.f32 %v719_v15, %v3071_v32 }
 0x224   :  { %v2518_v22 = vadd.f32 %v650_v18, %v3067_v10  ;;  %v2534_v34 = vadd.f32 %v721_v19, %v3073_v33 }
 0x225   :  { %v1905_v23 = vmul.f32 -1.442695, %v2517_v16  ;;  %v1907_v35 = vmul.f32 -1.442695, %v2533_v31 }
 0x226   :  { %v1906_v28 = vmul.f32 -1.442695, %v2518_v22 }
 0x227   :  { %2607 = vpow2.f32 %v1905_v23 }
 0x228   :  { %2609 = vpow2.f32 %v1906_v28 }
 0x229   :  { %2611 = vtanh.f32 %v2534_v34 }
 0x22a   :  { %2613 = vpow2.f32 %v1907_v35 }
 0x231   :  { %v2608_v36 = vpop.eup %2607 }
 0x232   :  { %v737_v39 = vadd.f32 1.0, %v2608_v36  ;;  %v2610_v42 = vpop.eup %2609 }
 0x233   :  { %v738_v47 = vadd.f32 1.0, %v2610_v42  ;;  %v2612_v48 = vpop.eup %2611 }
 0x234   :  { %2615 = vrcp.f32 %v737_v39  ;;  %v2614_v49 = vpop.eup %2613 }
 0x235   :  { %2617 = vrcp.f32 %v738_v47  ;;  %v739_v55 = vadd.f32 1.0, %v2614_v49 }
 0x237   :  { %2619 = vrcp.f32 %v739_v55 }
 0x23e   :  { %v2616_v50 = vpop.eup %2615 }
 0x23f   :  { %v747_v51 = vmul.f32 %v2616_v50, %v2612_v48  ;;  %v2618_v52 = vpop.eup %2617 }
 0x240   :  { %v748_v62 = vmul.f32 %v2618_v52, %v3077_v1 }
 0x241   :  { %v2620_v2 = vpop.eup %2619 }
 0x242   :  { %v3119_v63 = vadd.f32 %v748_v62, %v747_v51 }
 0x244   :  { %2621 = vtanh.f32 %v3119_v63 }
 0x24e   :  { %v2622_v5 = vpop.eup %2621 }
 0x24f   :  { %v751_v11 = vmul.f32 %v2622_v5, %v2620_v2 }
 0x251   :  { %817 = vmatmul.mubr.f32.vlgmr.msra.gmra.mrb[4].mxu0 %v751_v11  ;;  %888 = vmatmul.mubr.f32.vlgmr.msra.gmra.mrb[4].mxu1 %v751_v11 }
 0x252   :  { %2174 = vmatpush1.bf16.msra.mxu0 %v2877_v14  ;;  %2206 = vmatpush1.bf16.msra.mxu1 %v2881_v17 }
 0x253   :  { %2176 = vmatprep.subr.bf16.mxu0 %v2890_v25  ;;  %2208 = vmatprep.subr.bf16.mxu1 %v2892_v26 }
 0x254   :  { %986 = vmatprep.mubr.f32.mxu0 %v2797_v0  ;;  %1057 = vmatprep.mubr.f32.mxu1 %v2797_v0 }
 0x256   :  { %2178 = vmatpush1.bf16.msra.mxu0 %v2896_v29  ;;  %2210 = vmatpush1.bf16.msra.mxu1 %v2898_v30 }
 0x257   :  { %2180 = vmatprep.subr.bf16.mxu0 %v2909_v40  ;;  %2212 = vmatprep.subr.bf16.mxu1 %v2911_v41 }
 0x25a   :  { %2182 = vmatpush1.bf16.msra.mxu0 %v2915_v44  ;;  %2214 = vmatpush1.bf16.msra.mxu1 %v2917_v45 }
 0x25b   :  { %2184 = vmatprep.subr.bf16.mxu0 %v2928_v53  ;;  %2216 = vmatprep.subr.bf16.mxu1 %v2930_v54 }
 0x25e   :  { %2186 = vmatpush1.bf16.msra.mxu0 %v2934_v57  ;;  %2218 = vmatpush1.bf16.msra.mxu1 %v2936_v58 }
 0x25f   :  { %2188 = vmatprep.subr.bf16.mxu0 %v2947_v3  ;;  %2220 = vmatprep.subr.bf16.mxu1 %v2949_v4 }
 0x262   :  { %2190 = vmatpush1.bf16.msra.mxu0 %v2953_v7  ;;  %2222 = vmatpush1.bf16.msra.mxu1 %v2955_v8 }
 0x263   :  { %2192 = vmatprep.subr.bf16.mxu0 %v2966_v20  ;;  %2224 = vmatprep.subr.bf16.mxu1 %v2968_v21 }
 0x266   :  { %2194 = vmatpush1.bf16.msra.mxu0 %v2972_v24  ;;  %2226 = vmatpush1.bf16.msra.mxu1 %v2974_v27 }
 0x267   :  { %2196 = vmatprep.subr.bf16.mxu0 %v2985_v37  ;;  %2228 = vmatprep.subr.bf16.mxu1 %v2987_v38 }
 0x26a   :  { %2198 = vmatpush1.bf16.msra.mxu0 %v2991_v43  ;;  %2230 = vmatpush1.bf16.msra.mxu1 %v2993_v46 }
 0x26b   :  { %2200 = vmatprep.subr.bf16.mxu0 %v3004_v56  ;;  %2232 = vmatprep.subr.bf16.mxu1 %v3006_v59 }
 0x26e   :  { %2202 = vmatpush1.bf16.msra.mxu0 %v3010_v60  ;;  %2234 = vmatpush1.bf16.msra.mxu1 %v3012_v61 }
 0x26f   :  { %2236 = vmatprep.subr.bf16.mxu0 %v2871_v9  ;;  %2268 = vmatprep.subr.bf16.mxu1 %v2875_v13 }
 0x324   :  { %v818_v1 = vpop.f32.mrb[4].mxu0  ;;  %v889_v12 = vpop.f32.mrb[4].mxu1 }
 0x325   :  { %v2519_v15 = vadd.f32 %v818_v1, %v3065_v6  ;;  %v820_v16 = vpop.f32.mrb[5].mxu0  ;;  %v891_v18 = vpop.f32.mrb[5].mxu1  ;;  %v2535_v28 = vadd.f32 %v889_v12, %v3071_v32 }
 0x326   :  { %v2520_v19 = vadd.f32 %v820_v16, %v3067_v10  ;;  %v2536_v31 = vadd.f32 %v891_v18, %v3073_v33 }
 0x327   :  { %v1908_v22 = vmul.f32 -1.442695, %v2519_v15  ;;  %v1910_v34 = vmul.f32 -1.442695, %v2535_v28 }
 0x328   :  { %v1909_v23 = vmul.f32 -1.442695, %v2520_v19 }
 0x329   :  { %2623 = vpow2.f32 %v1908_v22 }
 0x32a   :  { %2625 = vpow2.f32 %v1909_v23 }
 0x32b   :  { %2627 = vtanh.f32 %v2536_v31 }
 0x32c   :  { %2629 = vpow2.f32 %v1910_v34 }
 0x333   :  { %v2624_v35 = vpop.eup %2623 }
 0x334   :  { %v907_v36 = vadd.f32 1.0, %v2624_v35  ;;  %v2626_v39 = vpop.eup %2625 }
 0x335   :  { %v908_v42 = vadd.f32 1.0, %v2626_v39  ;;  %v2628_v47 = vpop.eup %2627 }
 0x336   :  { %2631 = vrcp.f32 %v907_v36  ;;  %v2630_v48 = vpop.eup %2629 }
 0x337   :  { %2633 = vrcp.f32 %v908_v42  ;;  %v909_v52 = vadd.f32 1.0, %v2630_v48 }
 0x339   :  { %2635 = vrcp.f32 %v909_v52 }
 0x340   :  { %v2632_v49 = vpop.eup %2631 }
 0x341   :  { %v917_v50 = vmul.f32 %v2632_v49, %v2628_v47  ;;  %v2634_v51 = vpop.eup %2633 }
 0x342   :  { %v918_v55 = vmul.f32 %v2634_v51, %v3119_v63 }
 0x343   :  { %v2636_v2 = vpop.eup %2635 }
 0x344   :  { %v3161_v62 = vadd.f32 %v918_v55, %v917_v50 }
 0x346   :  { %2637 = vtanh.f32 %v3161_v62 }
 0x350   :  { %v2638_v5 = vpop.eup %2637 }
 0x351   :  { %v921_v11 = vmul.f32 %v2638_v5, %v2636_v2 }
 0x353   :  { %987 = vmatmul.mubr.f32.vlgmr.msra.gmra.mrb[6].mxu0 %v921_v11  ;;  %1058 = vmatmul.mubr.f32.vlgmr.msra.gmra.mrb[6].mxu1 %v921_v11 }
 0x354   :  { %2238 = vmatpush1.bf16.msra.mxu0 %v2877_v14  ;;  %2270 = vmatpush1.bf16.msra.mxu1 %v2881_v17 }
 0x355   :  { %2240 = vmatprep.subr.bf16.mxu0 %v2890_v25  ;;  %2272 = vmatprep.subr.bf16.mxu1 %v2892_v26 }
 0x356   :  { %1156 = vmatprep.mubr.f32.mxu0 %v2797_v0  ;;  %1227 = vmatprep.mubr.f32.mxu1 %v2797_v0 }
 0x358   :  { %2242 = vmatpush1.bf16.msra.mxu0 %v2896_v29  ;;  %2274 = vmatpush1.bf16.msra.mxu1 %v2898_v30 }
 0x359   :  { %2244 = vmatprep.subr.bf16.mxu0 %v2909_v40  ;;  %2276 = vmatprep.subr.bf16.mxu1 %v2911_v41 }
 0x35c   :  { %2246 = vmatpush1.bf16.msra.mxu0 %v2915_v44  ;;  %2278 = vmatpush1.bf16.msra.mxu1 %v2917_v45 }
 0x35d   :  { %2248 = vmatprep.subr.bf16.mxu0 %v2928_v53  ;;  %2280 = vmatprep.subr.bf16.mxu1 %v2930_v54 }
 0x360   :  { %2250 = vmatpush1.bf16.msra.mxu0 %v2934_v57  ;;  %2282 = vmatpush1.bf16.msra.mxu1 %v2936_v58 }
 0x361   :  { %2252 = vmatprep.subr.bf16.mxu0 %v2947_v3  ;;  %2284 = vmatprep.subr.bf16.mxu1 %v2949_v4 }
 0x364   :  { %2254 = vmatpush1.bf16.msra.mxu0 %v2953_v7  ;;  %2286 = vmatpush1.bf16.msra.mxu1 %v2955_v8 }
 0x365   :  { %2256 = vmatprep.subr.bf16.mxu0 %v2966_v20  ;;  %2288 = vmatprep.subr.bf16.mxu1 %v2968_v21 }
 0x368   :  { %2258 = vmatpush1.bf16.msra.mxu0 %v2972_v24  ;;  %2290 = vmatpush1.bf16.msra.mxu1 %v2974_v27 }
 0x369   :  { %2260 = vmatprep.subr.bf16.mxu0 %v2985_v37  ;;  %2292 = vmatprep.subr.bf16.mxu1 %v2987_v38 }
 0x36c   :  { %2262 = vmatpush1.bf16.msra.mxu0 %v2991_v43  ;;  %2294 = vmatpush1.bf16.msra.mxu1 %v2993_v46 }
 0x36d   :  { %2264 = vmatprep.subr.bf16.mxu0 %v3004_v56  ;;  %2296 = vmatprep.subr.bf16.mxu1 %v3006_v59 }
 0x370   :  { %2266 = vmatpush1.bf16.msra.mxu0 %v3010_v60  ;;  %2298 = vmatpush1.bf16.msra.mxu1 %v3012_v61 }
 0x371   :  { %2300 = vmatprep.subr.bf16.mxu0 %v2871_v9  ;;  %2332 = vmatprep.subr.bf16.mxu1 %v2875_v13 }
 0x426   :  { %v988_v63 = vpop.f32.mrb[6].mxu0  ;;  %v1059_v1 = vpop.f32.mrb[6].mxu1 }
 0x427   :  { %v2521_v12 = vadd.f32 %v988_v63, %v3065_v6  ;;  %v990_v15 = vpop.f32.mrb[7].mxu0  ;;  %v1061_v16 = vpop.f32.mrb[7].mxu1  ;;  %v2537_v23 = vadd.f32 %v1059_v1, %v3071_v32 }
 0x428   :  { %v2522_v18 = vadd.f32 %v990_v15, %v3067_v10  ;;  %v2538_v28 = vadd.f32 %v1061_v16, %v3073_v33 }
 0x429   :  { %v1911_v19 = vmul.f32 -1.442695, %v2521_v12  ;;  %v1913_v31 = vmul.f32 -1.442695, %v2537_v23 }
 0x42a   :  { %v1912_v22 = vmul.f32 -1.442695, %v2522_v18 }
 0x42b   :  { %2639 = vpow2.f32 %v1911_v19 }
 0x42c   :  { %2641 = vpow2.f32 %v1912_v22 }
 0x42d   :  { %2643 = vtanh.f32 %v2538_v28 }
 0x42e   :  { %2645 = vpow2.f32 %v1913_v31 }
 0x435   :  { %v2640_v34 = vpop.eup %2639 }
 0x436   :  { %v1077_v35 = vadd.f32 1.0, %v2640_v34  ;;  %v2642_v36 = vpop.eup %2641 }
 0x437   :  { %v1078_v39 = vadd.f32 1.0, %v2642_v36  ;;  %v2644_v42 = vpop.eup %2643 }
 0x438   :  { %2647 = vrcp.f32 %v1077_v35  ;;  %v2646_v47 = vpop.eup %2645 }
 0x439   :  { %2649 = vrcp.f32 %v1078_v39  ;;  %v1079_v51 = vadd.f32 1.0, %v2646_v47 }
 0x43b   :  { %2651 = vrcp.f32 %v1079_v51 }
 0x442   :  { %v2648_v48 = vpop.eup %2647 }
 0x443   :  { %v1087_v49 = vmul.f32 %v2648_v48, %v2644_v42  ;;  %v2650_v50 = vpop.eup %2649 }
 0x444   :  { %v1088_v52 = vmul.f32 %v2650_v50, %v3161_v62 }
 0x445   :  { %v2652_v2 = vpop.eup %2651 }
 0x446   :  { %v3203_v55 = vadd.f32 %v1088_v52, %v1087_v49 }
 0x448   :  { %2653 = vtanh.f32 %v3203_v55 }
 0x452   :  { %v2654_v5 = vpop.eup %2653 }
 0x453   :  { %v1091_v11 = vmul.f32 %v2654_v5, %v2652_v2 }
 0x455   :  { %1157 = vmatmul.mubr.f32.vlgmr.msra.gmra.mrb[8].mxu0 %v1091_v11  ;;  %1228 = vmatmul.mubr.f32.vlgmr.msra.gmra.mrb[8].mxu1 %v1091_v11 }
 0x456   :  { %2302 = vmatpush1.bf16.msra.mxu0 %v2877_v14  ;;  %2334 = vmatpush1.bf16.msra.mxu1 %v2881_v17 }
 0x457   :  { %2304 = vmatprep.subr.bf16.mxu0 %v2890_v25  ;;  %2336 = vmatprep.subr.bf16.mxu1 %v2892_v26 }
 0x458   :  { %1326 = vmatprep.mubr.f32.mxu0 %v2797_v0  ;;  %1397 = vmatprep.mubr.f32.mxu1 %v2797_v0 }
 0x45a   :  { %2306 = vmatpush1.bf16.msra.mxu0 %v2896_v29  ;;  %2338 = vmatpush1.bf16.msra.mxu1 %v2898_v30 }
 0x45b   :  { %2308 = vmatprep.subr.bf16.mxu0 %v2909_v40  ;;  %2340 = vmatprep.subr.bf16.mxu1 %v2911_v41 }
 0x45e   :  { %2310 = vmatpush1.bf16.msra.mxu0 %v2915_v44  ;;  %2342 = vmatpush1.bf16.msra.mxu1 %v2917_v45 }
 0x45f   :  { %2312 = vmatprep.subr.bf16.mxu0 %v2928_v53  ;;  %2344 = vmatprep.subr.bf16.mxu1 %v2930_v54 }
 0x462   :  { %2314 = vmatpush1.bf16.msra.mxu0 %v2934_v57  ;;  %2346 = vmatpush1.bf16.msra.mxu1 %v2936_v58 }
 0x463   :  { %2316 = vmatprep.subr.bf16.mxu0 %v2947_v3  ;;  %2348 = vmatprep.subr.bf16.mxu1 %v2949_v4 }
 0x466   :  { %2318 = vmatpush1.bf16.msra.mxu0 %v2953_v7  ;;  %2350 = vmatpush1.bf16.msra.mxu1 %v2955_v8 }
 0x467   :  { %2320 = vmatprep.subr.bf16.mxu0 %v2966_v20  ;;  %2352 = vmatprep.subr.bf16.mxu1 %v2968_v21 }
 0x46a   :  { %2322 = vmatpush1.bf16.msra.mxu0 %v2972_v24  ;;  %2354 = vmatpush1.bf16.msra.mxu1 %v2974_v27 }
 0x46b   :  { %2324 = vmatprep.subr.bf16.mxu0 %v2985_v37  ;;  %2356 = vmatprep.subr.bf16.mxu1 %v2987_v38 }
 0x46e   :  { %2326 = vmatpush1.bf16.msra.mxu0 %v2991_v43  ;;  %2358 = vmatpush1.bf16.msra.mxu1 %v2993_v46 }
 0x46f   :  { %2328 = vmatprep.subr.bf16.mxu0 %v3004_v56  ;;  %2360 = vmatprep.subr.bf16.mxu1 %v3006_v59 }
 0x472   :  { %2330 = vmatpush1.bf16.msra.mxu0 %v3010_v60  ;;  %2362 = vmatpush1.bf16.msra.mxu1 %v3012_v61 }
 0x473   :  { %2364 = vmatprep.subr.bf16.mxu0 %v2871_v9  ;;  %2396 = vmatprep.subr.bf16.mxu1 %v2875_v13 }
 0x528   :  { %v1158_v62 = vpop.f32.mrb[8].mxu0  ;;  %v1229_v63 = vpop.f32.mrb[8].mxu1 }
 0x529   :  { %v2523_v1 = vadd.f32 %v1158_v62, %v3065_v6  ;;  %v1160_v12 = vpop.f32.mrb[9].mxu0  ;;  %v1231_v15 = vpop.f32.mrb[9].mxu1  ;;  %v2539_v22 = vadd.f32 %v1229_v63, %v3071_v32 }
 0x52a   :  { %v2524_v16 = vadd.f32 %v1160_v12, %v3067_v10  ;;  %v2540_v23 = vadd.f32 %v1231_v15, %v3073_v33 }
 0x52b   :  { %v1914_v18 = vmul.f32 -1.442695, %v2523_v1  ;;  %v1916_v28 = vmul.f32 -1.442695, %v2539_v22 }
 0x52c   :  { %v1915_v19 = vmul.f32 -1.442695, %v2524_v16 }
 0x52d   :  { %2655 = vpow2.f32 %v1914_v18 }
 0x52e   :  { %2657 = vpow2.f32 %v1915_v19 }
 0x52f   :  { %2659 = vtanh.f32 %v2540_v23 }
 0x530   :  { %2661 = vpow2.f32 %v1916_v28 }
 0x537   :  { %v2656_v31 = vpop.eup %2655 }
 0x538   :  { %v1247_v34 = vadd.f32 1.0, %v2656_v31  ;;  %v2658_v35 = vpop.eup %2657 }
 0x539   :  { %v1248_v36 = vadd.f32 1.0, %v2658_v35  ;;  %v2660_v39 = vpop.eup %2659 }
 0x53a   :  { %2663 = vrcp.f32 %v1247_v34  ;;  %v2662_v42 = vpop.eup %2661 }
 0x53b   :  { %2665 = vrcp.f32 %v1248_v36  ;;  %v1249_v50 = vadd.f32 1.0, %v2662_v42 }
 0x53d   :  { %2667 = vrcp.f32 %v1249_v50 }
 0x544   :  { %v2664_v47 = vpop.eup %2663 }
 0x545   :  { %v1257_v48 = vmul.f32 %v2664_v47, %v2660_v39  ;;  %v2666_v49 = vpop.eup %2665 }
 0x546   :  { %v1258_v51 = vmul.f32 %v2666_v49, %v3203_v55 }
 0x547   :  { %v2668_v2 = vpop.eup %2667 }
 0x548   :  { %v3245_v52 = vadd.f32 %v1258_v51, %v1257_v48 }
 0x54a   :  { %2669 = vtanh.f32 %v3245_v52 }
 0x554   :  { %v2670_v5 = vpop.eup %2669 }
 0x555   :  { %v1261_v11 = vmul.f32 %v2670_v5, %v2668_v2  ;;  %v1775_v5 = vld [vmem:[#allocation5 + $0x18] sm:$0xff] }
 0x557   :  { %1327 = vmatmul.mubr.f32.vlgmr.msra.gmra.mrb[10].mxu0 %v1261_v11  ;;  %1398 = vmatmul.mubr.f32.vlgmr.msra.gmra.mrb[10].mxu1 %v1261_v11 }
 0x558   :  { %2366 = vmatpush1.bf16.msra.mxu0 %v2877_v14  ;;  %2398 = vmatpush1.bf16.msra.mxu1 %v2881_v17 }
 0x559   :  { %2368 = vmatprep.subr.bf16.mxu0 %v2890_v25  ;;  %2400 = vmatprep.subr.bf16.mxu1 %v2892_v26 }
 0x55a   :  { %1496 = vmatprep.mubr.f32.mxu0 %v2797_v0  ;;  %1567 = vmatprep.mubr.f32.mxu1 %v2797_v0 }
 0x55c   :  { %2370 = vmatpush1.bf16.msra.mxu0 %v2896_v29  ;;  %2402 = vmatpush1.bf16.msra.mxu1 %v2898_v30 }
 0x55d   :  { %2372 = vmatprep.subr.bf16.mxu0 %v2909_v40  ;;  %2404 = vmatprep.subr.bf16.mxu1 %v2911_v41 }
 0x560   :  { %2374 = vmatpush1.bf16.msra.mxu0 %v2915_v44  ;;  %2406 = vmatpush1.bf16.msra.mxu1 %v2917_v45 }
 0x561   :  { %2376 = vmatprep.subr.bf16.mxu0 %v2928_v53  ;;  %2408 = vmatprep.subr.bf16.mxu1 %v2930_v54 }
 0x564   :  { %2378 = vmatpush1.bf16.msra.mxu0 %v2934_v57  ;;  %2410 = vmatpush1.bf16.msra.mxu1 %v2936_v58 }
 0x565   :  { %2380 = vmatprep.subr.bf16.mxu0 %v2947_v3  ;;  %2412 = vmatprep.subr.bf16.mxu1 %v2949_v4 }
 0x568   :  { %2382 = vmatpush1.bf16.msra.mxu0 %v2953_v7  ;;  %2414 = vmatpush1.bf16.msra.mxu1 %v2955_v8 }
 0x569   :  { %2384 = vmatprep.subr.bf16.mxu0 %v2966_v20  ;;  %2416 = vmatprep.subr.bf16.mxu1 %v2968_v21 }
 0x56c   :  { %2386 = vmatpush1.bf16.msra.mxu0 %v2972_v24  ;;  %2418 = vmatpush1.bf16.msra.mxu1 %v2974_v27 }
 0x56d   :  { %2388 = vmatprep.subr.bf16.mxu0 %v2985_v37  ;;  %2420 = vmatprep.subr.bf16.mxu1 %v2987_v38 }
 0x570   :  { %2390 = vmatpush1.bf16.msra.mxu0 %v2991_v43  ;;  %2422 = vmatpush1.bf16.msra.mxu1 %v2993_v46 }
 0x571   :  { %2392 = vmatprep.subr.bf16.mxu0 %v3004_v56  ;;  %2424 = vmatprep.subr.bf16.mxu1 %v3006_v59 }
 0x574   :  { %2394 = vmatpush1.bf16.msra.mxu0 %v3010_v60  ;;  %2426 = vmatpush1.bf16.msra.mxu1 %v3012_v61 }
 0x575   :  { %2428 = vmatprep.subr.bf16.mxu0 %v2871_v9  ;;  %2460 = vmatprep.subr.bf16.mxu1 %v2875_v13 }
 0x62a   :  { %v1328_v55 = vpop.f32.mrb[10].mxu0  ;;  %v1399_v62 = vpop.f32.mrb[10].mxu1 }
 0x62b   :  { %v2525_v63 = vadd.f32 %v1328_v55, %v3065_v6  ;;  %v1330_v1 = vpop.f32.mrb[11].mxu0  ;;  %v1401_v12 = vpop.f32.mrb[11].mxu1  ;;  %v2541_v19 = vadd.f32 %v1399_v62, %v3071_v32  ;;  %v1776_v55 = vld [vmem:[#allocation5 + $0x20] sm:$0xff]  ;;  %v1777_v62 = vld [vmem:[#allocation5 + $0x28] sm:$0xff] }
 0x62c   :  { %v2526_v15 = vadd.f32 %v1330_v1, %v3067_v10  ;;  %v2542_v22 = vadd.f32 %v1401_v12, %v3073_v33  ;;  %v1778_v1 = vld [vmem:[#allocation5 + $0x30] sm:$0xff]  ;;  %v1779_v12 = vld [vmem:[#allocation5 + $0x38] sm:$0xff] }
 0x62d   :  { %v1917_v16 = vmul.f32 -1.442695, %v2525_v63  ;;  %v1919_v23 = vmul.f32 -1.442695, %v2541_v19  ;;  %v2498_v63 = vpack.c.bf16 %v1777_v62, %v1776_v55 }
 0x62e   :  { %v1918_v18 = vmul.f32 -1.442695, %v2526_v15  ;;  %v2501_v15 = vpack.c.bf16 %v1779_v12, %v1778_v1 }
 0x62f   :  { %2671 = vpow2.f32 %v1917_v16  ;;  %v1780_v16 = vld [vmem:[#allocation5 + $0x40] sm:$0xff] }
 0x630   :  { %2673 = vpow2.f32 %v1918_v18  ;;  %v1781_v18 = vld [vmem:[#allocation5 + $0x48] sm:$0xff] }
 0x631   :  { %2675 = vtanh.f32 %v2542_v22  ;;  %v2504_v19 = vpack.c.bf16 %v1781_v18, %v1780_v16  ;;  %v1782_v22 = vld [vmem:[#allocation5 + $0x50] sm:$0xff] }
 0x632   :  { %2677 = vpow2.f32 %v1919_v23  ;;  %v1783_v23 = vld [vmem:[#allocation5 + $0x58] sm:$0xff] }
 0x639   :  { %v2672_v9 = vpop.eup %2671 }
 0x63a   :  { %v1417_v28 = vadd.f32 1.0, %v2672_v9  ;;  %v2674_v13 = vpop.eup %2673  ;;  %v2507_v9 = vpack.c.bf16 %v1783_v23, %v1782_v22 }
 0x63b   :  { %v1418_v31 = vadd.f32 1.0, %v2674_v13  ;;  %v2676_v34 = vpop.eup %2675  ;;  %v1785_v13 = vld [vmem:[#allocation5 + $0x68] sm:$0xff] }
 0x63c   :  { %2679 = vrcp.f32 %v1417_v28  ;;  %v2678_v35 = vpop.eup %2677  ;;  %v1784_v28 = vld [vmem:[#allocation5 + $0x60] sm:$0xff] }
 0x63d   :  { %2681 = vrcp.f32 %v1418_v31  ;;  %v1419_v47 = vadd.f32 1.0, %v2678_v35  ;;  %v2510_v31 = vpack.c.bf16 %v1785_v13, %v1784_v28  ;;  %v1787_v35 = vld [vmem:[#allocation5 + $0x78] sm:$0xff] }
 0x63f   :  { %2683 = vrcp.f32 %v1419_v47 }
 0x646   :  { %v2680_v36 = vpop.eup %2679 }
 0x647   :  { %v1427_v39 = vmul.f32 %v2680_v36, %v2676_v34  ;;  %v2682_v42 = vpop.eup %2681  ;;  %v1786_v34 = vld [vmem:[#allocation5 + $0x70] sm:$0xff] }
 0x648   :  { %v1428_v48 = vmul.f32 %v2682_v42, %v3245_v52  ;;  %v1774_v52 = vld [vmem:[#allocation5 + $0x10] sm:$0xff]  ;;  %v2513_v36 = vpack.c.bf16 %v1787_v35, %v1786_v34 }
 0x649   :  { %v2684_v50 = vpop.eup %2683  ;;  %v2495_v11 = vpack.c.bf16 %v1775_v5, %v1774_v52 }
 0x64a   :  { %v3287_v49 = vadd.f32 %v1428_v48, %v1427_v39 }
 0x64c   :  { %2685 = vtanh.f32 %v3287_v49 }
 0x656   :  { %v2686_v51 = vpop.eup %2685 }
 0x657   :  { %v1431_v2 = vmul.f32 %v2686_v51, %v2684_v50 }
 0x659   :  { %1497 = vmatmul.mubr.f32.vlgmr.msra.gmra.mrb[12].mxu0 %v1431_v2  ;;  %1568 = vmatmul.mubr.f32.vlgmr.msra.gmra.mrb[12].mxu1 %v1431_v2 }
 0x65a   :  { %2430 = vmatpush1.bf16.msra.mxu0 %v2877_v14  ;;  %2462 = vmatpush1.bf16.msra.mxu1 %v2881_v17 }
 0x65b   :  { %2432 = vmatprep.subr.bf16.mxu0 %v2890_v25  ;;  %2464 = vmatprep.subr.bf16.mxu1 %v2892_v26 }
 0x65c   :  { %1666 = vmatprep.mubr.f32.mxu0 %v2797_v0  ;;  %1737 = vmatprep.mubr.f32.mxu1 %v2797_v0 }
 0x65e   :  { %2434 = vmatpush1.bf16.msra.mxu0 %v2896_v29  ;;  %2466 = vmatpush1.bf16.msra.mxu1 %v2898_v30 }
 0x65f   :  { %2436 = vmatprep.subr.bf16.mxu0 %v2909_v40  ;;  %2468 = vmatprep.subr.bf16.mxu1 %v2911_v41 }
 0x662   :  { %2438 = vmatpush1.bf16.msra.mxu0 %v2915_v44  ;;  %2470 = vmatpush1.bf16.msra.mxu1 %v2917_v45 }
 0x663   :  { %2440 = vmatprep.subr.bf16.mxu0 %v2928_v53  ;;  %2472 = vmatprep.subr.bf16.mxu1 %v2930_v54 }
 0x666   :  { %2442 = vmatpush1.bf16.msra.mxu0 %v2934_v57  ;;  %2474 = vmatpush1.bf16.msra.mxu1 %v2936_v58 }
 0x667   :  { %2444 = vmatprep.subr.bf16.mxu0 %v2947_v3  ;;  %2476 = vmatprep.subr.bf16.mxu1 %v2949_v4 }
 0x66a   :  { %2446 = vmatpush1.bf16.msra.mxu0 %v2953_v7  ;;  %2478 = vmatpush1.bf16.msra.mxu1 %v2955_v8 }
 0x66b   :  { %2448 = vmatprep.subr.bf16.mxu0 %v2966_v20  ;;  %2480 = vmatprep.subr.bf16.mxu1 %v2968_v21 }
 0x66e   :  { %2450 = vmatpush1.bf16.msra.mxu0 %v2972_v24  ;;  %2482 = vmatpush1.bf16.msra.mxu1 %v2974_v27 }
 0x66f   :  { %2452 = vmatprep.subr.bf16.mxu0 %v2985_v37  ;;  %2484 = vmatprep.subr.bf16.mxu1 %v2987_v38 }
 0x672   :  { %2454 = vmatpush1.bf16.msra.mxu0 %v2991_v43  ;;  %2486 = vmatpush1.bf16.msra.mxu1 %v2993_v46 }
 0x673   :  { %2456 = vmatprep.subr.bf16.mxu0 %v3004_v56  ;;  %2488 = vmatprep.subr.bf16.mxu1 %v3006_v59  ;;  %v1772_v56 = vld [vmem:[#allocation5] sm:$0xff]  ;;  %v1773_v59 = vld [vmem:[#allocation5 + $0x8] sm:$0xff] }
 0x676   :  { %2458 = vmatpush1.bf16.msra.mxu0 %v3010_v60  ;;  %2490 = vmatpush1.bf16.msra.mxu1 %v3012_v61  ;;  %v2492_v60 = vpack.c.bf16 %v1773_v59, %v1772_v56  ;;  %v2798_v61 = vmov 0.0|0.0  }
 0x677   :  { %2491 = vmatprep.subr.bf16.mxu0 %v2798_v61 }
 0x72c   :  { %v1498_v14 = vpop.f32.mrb[12].mxu0  ;;  %v1569_v17 = vpop.f32.mrb[12].mxu1 }
 0x72d   :  { %v2527_v25 = vadd.f32 %v1498_v14, %v3065_v6  ;;  %v1500_v26 = vpop.f32.mrb[13].mxu0  ;;  %v1571_v29 = vpop.f32.mrb[13].mxu1  ;;  %v2543_v44 = vadd.f32 %v1569_v17, %v3071_v32 }
 0x72e   :  { %v2528_v30 = vadd.f32 %v1500_v26, %v3067_v10  ;;  %v2544_v45 = vadd.f32 %v1571_v29, %v3073_v33 }
 0x72f   :  { %v1920_v40 = vmul.f32 -1.442695, %v2527_v25  ;;  %v1922_v53 = vmul.f32 -1.442695, %v2543_v44 }
 0x730   :  { %v1921_v41 = vmul.f32 -1.442695, %v2528_v30 }
 0x731   :  { %2687 = vpow2.f32 %v1920_v40 }
 0x732   :  { %2689 = vpow2.f32 %v1921_v41 }
 0x733   :  { %2691 = vtanh.f32 %v2544_v45 }
 0x734   :  { %2693 = vpow2.f32 %v1922_v53 }
 0x73b   :  { %v2688_v54 = vpop.eup %2687 }
 0x73c   :  { %v1587_v57 = vadd.f32 1.0, %v2688_v54  ;;  %v2690_v58 = vpop.eup %2689 }
 0x73d   :  { %v1588_v3 = vadd.f32 1.0, %v2690_v58  ;;  %v2692_v4 = vpop.eup %2691  ;;  %v1926_v58 = vld [vmem:[%s3356_s5] ss:$0 sm:$0xff] }
 0x73e   :  { %2695 = vrcp.f32 %v1587_v57  ;;  %v2694_v7 = vpop.eup %2693 }
 0x73f   :  { %2697 = vrcp.f32 %v1588_v3  ;;  %v1589_v24 = vadd.f32 1.0, %v2694_v7 }
 0x741   :  { %2699 = vrcp.f32 %v1589_v24 }
 0x748   :  { %v2696_v8 = vpop.eup %2695 }
 0x749   :  { %v1597_v20 = vmul.f32 %v2696_v8, %v2692_v4  ;;  %v2698_v21 = vpop.eup %2697 }
 0x74a   :  { %v1598_v27 = vmul.f32 %v2698_v21, %v3287_v49 }
 0x74b   :  { %v2700_v38 = vpop.eup %2699 }
 0x74c   :  { %v3327_v37 = vadd.f32 %v1598_v27, %v1597_v20 }
 0x74e   :  { %2701 = vtanh.f32 %v3327_v37 }
 0x758   :  { %v2702_v43 = vpop.eup %2701 }
 0x759   :  { %v1601_v46 = vmul.f32 %v2702_v43, %v2700_v38 }
 0x75b   :  { %1667 = vmatmul.mubr.f32.vlgmr.msra.gmra.mrb[14].mxu0 %v1601_v46  ;;  %1738 = vmatmul.mubr.f32.vlgmr.msra.gmra.mrb[14].mxu1 %v1601_v46 }
 0x75c   :  { %2493 = vmatpush3.bf16.msra.mxu0 %v2492_v60  ;;  %1976 = vmatprep.mubr.msk.f32.mxu0 %vm2799_vm2, %v2797_v0 }
 0x75d   :  { %2494 = vmatprep.subr.bf16.mxu0 %v2798_v61 }
 0x760   :  { %2496 = vmatpush3.bf16.msra.mxu0 %v2495_v11 }
 0x761   :  { %2497 = vmatprep.subr.bf16.mxu0 %v2798_v61 }
 0x764   :  { %2499 = vmatpush3.bf16.msra.mxu0 %v2498_v63 }
 0x765   :  { %2500 = vmatprep.subr.bf16.mxu0 %v2798_v61 }
 0x768   :  { %2502 = vmatpush3.bf16.msra.mxu0 %v2501_v15 }
 0x769   :  { %2503 = vmatprep.subr.bf16.mxu0 %v2798_v61 }
 0x76c   :  { %2505 = vmatpush3.bf16.msra.mxu0 %v2504_v19 }
 0x76d   :  { %2506 = vmatprep.subr.bf16.mxu0 %v2798_v61 }
 0x770   :  { %2508 = vmatpush3.bf16.msra.mxu0 %v2507_v9 }
 0x771   :  { %2509 = vmatprep.subr.bf16.mxu0 %v2798_v61 }
 0x774   :  { %2511 = vmatpush3.bf16.msra.mxu0 %v2510_v31 }
 0x775   :  { %2512 = vmatprep.subr.bf16.mxu0 %v2798_v61 }
 0x778   :  { %2514 = vmatpush3.bf16.msra.mxu0 %v2513_v36 }
 0x82e   :  { %v1668_v39 = vpop.f32.mrb[14].mxu0  ;;  %v1739_v42 = vpop.f32.mrb[14].mxu1 }
 0x82f   :  { %v2529_v47 = vadd.f32 %v1668_v39, %v3065_v6  ;;  %v1670_v48 = vpop.f32.mrb[15].mxu0  ;;  %v1741_v49 = vpop.f32.mrb[15].mxu1  ;;  %v2545_v0 = vadd.f32 %v1739_v42, %v3071_v32 }
 0x830   :  { %v2530_v50 = vadd.f32 %v1670_v48, %v3067_v10  ;;  %v2546_v14 = vadd.f32 %v1741_v49, %v3073_v33 }
 0x831   :  { %v1923_v51 = vmul.f32 -1.442695, %v2529_v47  ;;  %v1925_v17 = vmul.f32 -1.442695, %v2545_v0 }
 0x832   :  { %v1924_v2 = vmul.f32 -1.442695, %v2530_v50 }
 0x833   :  { %2703 = vpow2.f32 %v1923_v51 }
 0x834   :  { %2705 = vpow2.f32 %v1924_v2 }
 0x835   :  { %2707 = vtanh.f32 %v2546_v14 }
 0x836   :  { %2709 = vpow2.f32 %v1925_v17 }
 0x83d   :  { %v2704_v25 = vpop.eup %2703 }
 0x83e   :  { %v1757_v26 = vadd.f32 1.0, %v2704_v25  ;;  %v2706_v29 = vpop.eup %2705 }
 0x83f   :  { %v1758_v6 = vadd.f32 1.0, %v2706_v29  ;;  %v2708_v30 = vpop.eup %2707 }
 0x840   :  { %2711 = vrcp.f32 %v1757_v26  ;;  %v2710_v40 = vpop.eup %2709 }
 0x841   :  { %2713 = vrcp.f32 %v1758_v6  ;;  %v1759_v45 = vadd.f32 1.0, %v2710_v40 }
 0x843   :  { %2715 = vrcp.f32 %v1759_v45 }
 0x84a   :  { %v2712_v10 = vpop.eup %2711 }
 0x84b   :  { %v1767_v41 = vmul.f32 %v2712_v10, %v2708_v30  ;;  %v2714_v44 = vpop.eup %2713 }
 0x84c   :  { %v1768_v53 = vmul.f32 %v2714_v44, %v3327_v37 }
 0x84d   :  { %v2716_v33 = vpop.eup %2715 }
 0x84e   :  { %v1769_v32 = vadd.f32 %v1768_v53, %v1767_v41 }
 0x850   :  { %2717 = vtanh.f32 %v1769_v32 }
 0x85a   :  { %v2718_v54 = vpop.eup %2717 }
 0x85b   :  { %v1771_v57 = vmul.f32 %v2718_v54, %v2716_v33 }
 0x85d   :  { %1977 = vmatmul.mubr.f32.vlgmr.msra.gmra.mrb[16].mxu0 %v1771_v57 }
 0x930   :  { %v1861_v3 = vpop.f32.mrb[16].mxu0 }
 0x931   :  { %v1862_v4 = vadd.f32 %v1926_v58, %v1861_v3  ;;  %v1978_v7 = vpop.f32.mrb[17].mxu0 }
 0x933   :  { %1865 = vst [vmem:[#allocation7] sm:$0xff] %v1862_v4 }
 0x934   :  { %2774 = shalt.err (!%p2771_p6)
}
 0x935   :  { %s2775_s24 = scalar_lea.hbm %s3357_s6, 128 }
 0x936   :  { %p2776_p7 = scmp.ne.s32.totalorder %s3357_s6, %s2775_s24  ;;  %p2779_p8 = scmp.lt.u32.totalorder %s2775_s24, %s3357_s6 }
 0x938   :  { %p2781_p9 = pnand %p2779_p8, %p2776_p7 }
 0x93a   :  { %2784 = shalt.err (!%p2781_p9)
}
 0x93b   :  { %1875 = dma.vmem_to_hbm [thread:$0]  %s1873_s2, 128, %s3357_s6, [#allocation4]  }
 0x93c   :  { %2789 = dma.done.wait [#allocation4], 128  }
 0x93d   :  { %2790 = vsyncadd [#allocation4], 4294967168 }
 0x93e   :  { %1879 = vsyncpa [#allocation3], 1 }
 0x93f   :  { %1880 = vsyncpa [#allocation6], 1 }
 0x940   :  { %1881 = vsyncpa [#allocation4], 1 }

</bundles_post_ra>
